<compile_context>
chip_gen: v7x
topology: tpu7x:2x2x1
jax: 0.10.0
libtpu: 0.0.40
codegen_flags: <defaults>
</compile_context>

<pallas_src>
import functools
import math

import jax
import jax.numpy as jnp
from jax.experimental import pallas as pl
from jax.experimental.pallas import tpu as pltpu  # noqa: F401  (TPU backend)

# -----------------------------------------------------------------------------
# Config (small, deterministic, consistent with the reference module)
# -----------------------------------------------------------------------------
IMG_SIZE = 16
PATCH = 8
IN_CHANNELS = 3
HIDDEN = 32
NUM_HEADS = 4
MLP_DIM = 64
NUM_LAYERS = 1          # Encoder builds num_layers + 1 = 2 blocks
LN_EPS = 1e-6
LANE = 128              # lane-padded width for all activations / weights

_SQRT1_2 = 0.7071067811865476


# -----------------------------------------------------------------------------
# Single fused kernel: patch embedding + cls/pos + all encoder blocks
# -----------------------------------------------------------------------------
def transformer_kernel(patches_ref, wp_ref, postable_ref, bias_ref,
                       wmat_ref, vec_ref, o_ref, *,
                       hidden, num_heads, num_blocks):
    R, HP = postable_ref.shape          # R = padded token rows, HP = 128
    dh = hidden // num_heads
    scale = 1.0 / math.sqrt(dh)

    # 1.0 on the `hidden` real columns, 0.0 on the lane padding.
    col_mask = (jax.lax.broadcasted_iota(jnp.int32, (1, HP), 1) < hidden
                ).astype(jnp.float32)

    def layernorm(t, w, b):
        # Biased variance over the `hidden` real columns only (padding is 0),
        # matching torch.nn.LayerNorm.  Padded columns stay exactly 0 because
        # d==0 there and w,b are zero-padded.
        mean = jnp.sum(t, axis=-1, keepdims=True) * (1.0 / hidden)
        d = (t - mean) * col_mask
        var = jnp.sum(d * d, axis=-1, keepdims=True) * (1.0 / hidden)
        return d * jax.lax.rsqrt(var + LN_EPS) * w + b

    def gelu_exact(t):
        # Exact (erf) GELU, matching torch.nn.functional.gelu's default.
        # TODO(synk): lax.erf has no guaranteed Mosaic lowering; emulate it with
        # the Abramowitz–Stegun 7.1.26 polynomial (|erf err| <= 1.5e-7, i.e.
        # f32-level), built only from exp / mul / select which lower cleanly.
        z = jnp.abs(t) * _SQRT1_2
        u = 1.0 / (1.0 + 0.3275911 * z)
        poly = u * (0.254829592 + u * (-0.284496736 + u * (1.421413741 +
                    u * (-1.453152027 + u * 1.061405429))))
        erf_abs = 1.0 - poly * jnp.exp(-(z * z))
        erf_z = jnp.where(t < 0, -erf_abs, erf_abs)
        return 0.5 * t * (1.0 + erf_z)

    # ---- patch embedding + cls token + positional embedding ----------------
    # patches has a zero dummy row per image for the cls slot; postable holds
    # (cls + pos[0]) on cls rows, (conv_bias + pos[1+p]) on patch rows and 0 on
    # padding rows, so the whole assembly is one matmul + one add.
    # NOTE: dots use the default MXU f32 precision; pass
    # precision=lax.Precision.HIGHEST if bit-parity with torch is required.
    x = jnp.dot(patches_ref[...], wp_ref[...],
                preferred_element_type=jnp.float32) + postable_ref[...]
    attn_bias = bias_ref[...]           # (R, R): 0 same-image, -1e30 otherwise

    # ---- encoder blocks (statically unrolled; weights stay VMEM-resident) --
    for l in range(num_blocks):
        vec = vec_ref[l]                                   # (8, HP) packed vectors
        ln1w, ln1b = vec[0:1], vec[1:2]
        bqkv, bo = vec[2:3], vec[3:4]
        ln2w, ln2b = vec[4:5], vec[5:6]
        b1, b2 = vec[6:7], vec[7:8]
        wqkv, wo = wmat_ref[l, 0], wmat_ref[l, 1]          # (HP, HP) each
        w1, w2 = wmat_ref[l, 2], wmat_ref[l, 3]

        # --- attention sub-block (pre-LN) ---
        resid = x
        xn = layernorm(x, ln1w, ln1b)
        qkv = jnp.dot(xn, wqkv, preferred_element_type=jnp.float32) + bqkv  # (R, HP)
        attn = resid + bo               # residual + out-proj bias, accumulate heads
        for h in range(num_heads):
            q = qkv[:, h * dh:(h + 1) * dh]                              # (R, dh)
            k = qkv[:, hidden + h * dh:hidden + (h + 1) * dh]
            v = qkv[:, 2 * hidden + h * dh:2 * hidden + (h + 1) * dh]
            s = jax.lax.dot_general(q, k, (((1,), (1,)), ((), ())),
                                    preferred_element_type=jnp.float32)
            # block-diagonal mask keeps images (and the padded rows) separate
            s = s * scale + attn_bias
            s = s - jnp.max(s, axis=-1, keepdims=True)
            e = jnp.exp(s)
            p = e / jnp.sum(e, axis=-1, keepdims=True)      # exact softmax
            ctx = jnp.dot(p, v, preferred_element_type=jnp.float32)      # (R, dh)
            # head merge folded into the output projection: Wo row-slice is
            # sublane-aligned (dh == 8), so no lane concatenation is needed.
            attn = attn + jnp.dot(ctx, wo[h * dh:(h + 1) * dh, :],
                                  preferred_element_type=jnp.float32)
        x = attn

        # --- MLP sub-block (pre-LN) ---
        resid = x
        xn = layernorm(x, ln2w, ln2b)
        y = jnp.dot(xn, w1, preferred_element_type=jnp.float32) + b1
        y = gelu_exact(y)
        y = jnp.dot(y, w2, preferred_element_type=jnp.float32) + b2
        x = y + resid

    # Reference Encoder applies no final LayerNorm, so none is applied here.
    o_ref[...] = x.astype(o_ref.dtype)   # single dense (R, 128) store


# -----------------------------------------------------------------------------
# Wrapper: layout glue (patch extraction, padding, mask) + one fused pallas_call
# -----------------------------------------------------------------------------
@jax.jit
def transformer_forward(x, packed):
    # x: (B, C, H, W) NCHW, matching the PyTorch Conv2d input convention.
    B, C, Him, Wim = x.shape
    nH, nW = Him // PATCH, Wim // PATCH
    nP = nH * nW
    S = nP + 1
    HP = packed["wp"].shape[1]
    R = ((B * S + 7) // 8) * 8          # pad token rows to a sublane multiple

    # Patch extraction (pure layout glue): flatten each patch in (C, ph, pw)
    # order, matching torch's Conv2d weight.reshape(hidden, C*ph*pw) layout,
    # and prepend a zero dummy row per image for the cls slot.
    p = x.reshape(B, C, nH, PATCH, nW, PATCH).transpose(0, 2, 4, 1, 3, 5)
    p = p.reshape(B, nP, C * PATCH * PATCH)
    p = jnp.pad(p, ((0, 0), (1, 0), (0, 0)))               # dummy cls row
    p = p.reshape(B * S, -1)
    patches = jnp.pad(p, ((0, R - B * S), (0, 0)))         # zero padding rows

    # Additive token table (cls+pos / conv-bias+pos), tiled over batch,
    # zero on padding rows.
    postable = jnp.pad(jnp.tile(packed["tok"], (B, 1)), ((0, R - B * S), (0, 0)))

    # Block-diagonal additive attention mask: rows of different images (and
    # the padding rows) never attend to each other.
    bid = jnp.arange(R, dtype=jnp.int32) // S
    attn_bias = jnp.where(bid[:, None] == bid[None, :], 0.0, -1e30
                          ).astype(jnp.float32)

    num_blocks = packed["wmat"].shape[0]
    kern = functools.partial(transformer_kernel, hidden=HIDDEN,
                             num_heads=NUM_HEADS, num_blocks=num_blocks)
    out = pl.pallas_call(
        kern,
        out_shape=jax.ShapeDtypeStruct((R, HP), jnp.float32),
    )(patches, packed["wp"], postable, attn_bias, packed["wmat"], packed["vec"])
    return out[:B * S, :HIDDEN].reshape(B, S, HIDDEN)


# -----------------------------------------------------------------------------
# Parameter init (deterministic, synthetic; mirrors the module's structure)
# -----------------------------------------------------------------------------
def init_params(key):
    n_patches = (IMG_SIZE // PATCH) * (IMG_SIZE // PATCH)
    patch_dim = IN_CHANNELS * PATCH * PATCH
    num_blocks = NUM_LAYERS + 1
    keys = iter(jax.random.split(key, 64))

    def dense(k_in, k_out):
        # Stored as (in, out) = torch Linear weight transposed.
        w = jax.random.normal(next(keys), (k_in, k_out), jnp.float32) * 0.02
        b = jax.random.normal(next(keys), (1, k_out), jnp.float32) * 1e-6
        return w, b

    params = {}
    params["wp"], params["bp"] = dense(patch_dim, HIDDEN)       # Conv2d as matmul
    params["cls_token"] = jnp.zeros((1, HIDDEN), jnp.float32)   # nn.Parameter(zeros)
    params["pos_emb"] = jnp.zeros((n_patches + 1, HIDDEN), jnp.float32)

    blocks = []
    for _ in range(num_blocks):
        blk = {
            "ln1_w": jnp.ones((1, HIDDEN), jnp.float32),
            "ln1_b": jnp.zeros((1, HIDDEN), jnp.float32),
            "ln2_w": jnp.ones((1, HIDDEN), jnp.float32),
            "ln2_b": jnp.zeros((1, HIDDEN), jnp.float32),
        }
        blk["wq"], blk["bq"] = dense(HIDDEN, HIDDEN)
        blk["wk"], blk["bk"] = dense(HIDDEN, HIDDEN)
        blk["wv"], blk["bv"] = dense(HIDDEN, HIDDEN)
        blk["wo"], blk["bo"] = dense(HIDDEN, HIDDEN)
        blk["w1"], blk["b1"] = dense(HIDDEN, MLP_DIM)
        blk["w2"], blk["b2"] = dense(MLP_DIM, HIDDEN)
        blocks.append(blk)
    params["blocks"] = blocks
    return params


def pack_params(params):
    """One-time packing of module params into the kernel's padded slabs."""
    def padc(a, cols=LANE):                    # zero-pad columns to `cols`
        return jnp.pad(a, ((0, 0), (0, cols - a.shape[-1])))

    def pad2(a, rows=LANE, cols=LANE):         # zero-pad both dims
        return jnp.pad(a, ((0, rows - a.shape[0]), (0, cols - a.shape[1])))

    wp = padc(params["wp"])                                    # (pd, 128)
    # Token table: row 0 = cls + pos[0]; rows 1.. = conv_bias + pos[1:].
    tok = jnp.concatenate([params["cls_token"] + params["pos_emb"][0:1],
                           params["bp"] + params["pos_emb"][1:]], axis=0)
    tok = padc(tok)                                            # (S, 128)

    wmats, vecs = [], []
    for blk in params["blocks"]:
        wqkv = jnp.concatenate([blk["wq"], blk["wk"], blk["wv"]], axis=1)  # (H, 3H)
        bqkv = jnp.concatenate([blk["bq"], blk["bk"], blk["bv"]], axis=1)  # (1, 3H)
        wmats.append(jnp.stack([pad2(wqkv), pad2(blk["wo"]),
                                pad2(blk["w1"]), pad2(blk["w2"])], axis=0))
        vecs.append(jnp.concatenate(
            [padc(blk["ln1_w"]), padc(blk["ln1_b"]), padc(bqkv), padc(blk["bo"]),
             padc(blk["ln2_w"]), padc(blk["ln2_b"]), padc(blk["b1"]),
             padc(blk["b2"])], axis=0))                        # (8, 128)

    return {"wp": wp, "tok": tok,
            "wmat": jnp.stack(wmats, axis=0),                  # (L, 4, 128, 128)
            "vec": jnp.stack(vecs, axis=0)}                    # (L, 8, 128)


# -----------------------------------------------------------------------------
if __name__ == "__main__":
    key = jax.random.PRNGKey(0)
    k_x, k_p = jax.random.split(key)
    x = jax.random.normal(k_x, (2, IN_CHANNELS, IMG_SIZE, IMG_SIZE), jnp.float32)
    params = init_params(k_p)
    packed = pack_params(params)

    out = jax.block_until_ready(transformer_forward(x, packed))
    S = (IMG_SIZE // PATCH) ** 2 + 1
    assert out.shape == (2, S, HIDDEN)
    assert bool(jnp.all(jnp.isfinite(out)))
    print("KERNEL_OK")
</pallas_src>

<mosaic_0001>
module attributes {stable_mosaic.version = 11 : i64} {
  func.func @transformer_kernel(%arg0: memref<16x192xf32, #tpu.memory_space<vmem>>, %arg1: memref<192x128xf32, #tpu.memory_space<vmem>>, %arg2: memref<16x128xf32, #tpu.memory_space<vmem>>, %arg3: memref<16x16xf32, #tpu.memory_space<vmem>>, %arg4: memref<2x4x128x128xf32, #tpu.memory_space<vmem>>, %arg5: memref<2x8x128xf32, #tpu.memory_space<vmem>>, %arg6: memref<16x128xf32, #tpu.memory_space<vmem>>) attributes {dimension_semantics = [], scalar_prefetch = 0 : i64, scratch_operands = 0 : i64, tpu.core_type = #tpu.core_type<tc>} {
    %0 = tpu.iota {dimensions = array<i32: 1>} : vector<1x128xi32>
    %c32_i32 = arith.constant 32 : i32
    %1 = vector.broadcast %c32_i32 : i32 to vector<1x128xi32>
    %2 = arith.cmpi slt, %0, %1 : vector<1x128xi32>
    %3 = arith.extui %2 : vector<1x128xi1> to vector<1x128xi32>
    %4 = arith.sitofp %3 : vector<1x128xi32> to vector<1x128xf32>
    %c0 = arith.constant 0 : index
    %c0_0 = arith.constant 0 : index
    %5 = vector.load %arg0[%c0, %c0_0] : memref<16x192xf32, #tpu.memory_space<vmem>>, vector<16x192xf32>
    %c0_1 = arith.constant 0 : index
    %c0_2 = arith.constant 0 : index
    %6 = vector.load %arg1[%c0_1, %c0_2] : memref<192x128xf32, #tpu.memory_space<vmem>>, vector<192x128xf32>
    %cst = arith.constant dense<0.000000e+00> : vector<16x128xf32>
    %7 = tpu.matmul %5, %6, %cst {dimension_numbers = #tpu.dot_dimension_numbers<[1], [0], [0], [1], [0, 0, 1, 1], [], []>} : vector<16x192xf32>, vector<192x128xf32>, vector<16x128xf32> -> vector<16x128xf32>
    %c0_3 = arith.constant 0 : index
    %c0_4 = arith.constant 0 : index
    %8 = vector.load %arg2[%c0_3, %c0_4] : memref<16x128xf32, #tpu.memory_space<vmem>>, vector<16x128xf32>
    %9 = arith.addf %7, %8 : vector<16x128xf32>
    %c0_5 = arith.constant 0 : index
    %c0_6 = arith.constant 0 : index
    %10 = vector.load %arg3[%c0_5, %c0_6] : memref<16x16xf32, #tpu.memory_space<vmem>>, vector<16x16xf32>
    %c0_7 = arith.constant 0 : index
    %c0_8 = arith.constant 0 : index
    %c0_9 = arith.constant 0 : index
    %11 = vector.load %arg5[%c0_7, %c0_8, %c0_9] : memref<2x8x128xf32, #tpu.memory_space<vmem>>, vector<1x8x128xf32>
    %12 = vector.shape_cast %11 : vector<1x8x128xf32> to vector<8x128xf32>
    %13 = vector.extract_strided_slice %12 {offsets = [0, 0], sizes = [1, 128], strides = [1, 1]} : vector<8x128xf32> to vector<1x128xf32>
    %14 = vector.extract_strided_slice %12 {offsets = [1, 0], sizes = [1, 128], strides = [1, 1]} : vector<8x128xf32> to vector<1x128xf32>
    %15 = vector.extract_strided_slice %12 {offsets = [2, 0], sizes = [1, 128], strides = [1, 1]} : vector<8x128xf32> to vector<1x128xf32>
    %16 = vector.extract_strided_slice %12 {offsets = [3, 0], sizes = [1, 128], strides = [1, 1]} : vector<8x128xf32> to vector<1x128xf32>
    %17 = vector.extract_strided_slice %12 {offsets = [4, 0], sizes = [1, 128], strides = [1, 1]} : vector<8x128xf32> to vector<1x128xf32>
    %18 = vector.extract_strided_slice %12 {offsets = [5, 0], sizes = [1, 128], strides = [1, 1]} : vector<8x128xf32> to vector<1x128xf32>
    %19 = vector.extract_strided_slice %12 {offsets = [6, 0], sizes = [1, 128], strides = [1, 1]} : vector<8x128xf32> to vector<1x128xf32>
    %20 = vector.extract_strided_slice %12 {offsets = [7, 0], sizes = [1, 128], strides = [1, 1]} : vector<8x128xf32> to vector<1x128xf32>
    %c0_10 = arith.constant 0 : index
    %c0_11 = arith.constant 0 : index
    %c0_12 = arith.constant 0 : index
    %c0_13 = arith.constant 0 : index
    %21 = vector.load %arg4[%c0_10, %c0_11, %c0_12, %c0_13] : memref<2x4x128x128xf32, #tpu.memory_space<vmem>>, vector<1x1x128x128xf32>
    %22 = vector.shape_cast %21 : vector<1x1x128x128xf32> to vector<128x128xf32>
    %c0_14 = arith.constant 0 : index
    %c1 = arith.constant 1 : index
    %c0_15 = arith.constant 0 : index
    %c0_16 = arith.constant 0 : index
    %23 = vector.load %arg4[%c0_14, %c1, %c0_15, %c0_16] : memref<2x4x128x128xf32, #tpu.memory_space<vmem>>, vector<1x1x128x128xf32>
    %24 = vector.shape_cast %23 : vector<1x1x128x128xf32> to vector<128x128xf32>
    %c0_17 = arith.constant 0 : index
    %c2 = arith.constant 2 : index
    %c0_18 = arith.constant 0 : index
    %c0_19 = arith.constant 0 : index
    %25 = vector.load %arg4[%c0_17, %c2, %c0_18, %c0_19] : memref<2x4x128x128xf32, #tpu.memory_space<vmem>>, vector<1x1x128x128xf32>
    %26 = vector.shape_cast %25 : vector<1x1x128x128xf32> to vector<128x128xf32>
    %c0_20 = arith.constant 0 : index
    %c3 = arith.constant 3 : index
    %c0_21 = arith.constant 0 : index
    %c0_22 = arith.constant 0 : index
    %27 = vector.load %arg4[%c0_20, %c3, %c0_21, %c0_22] : memref<2x4x128x128xf32, #tpu.memory_space<vmem>>, vector<1x1x128x128xf32>
    %28 = vector.shape_cast %27 : vector<1x1x128x128xf32> to vector<128x128xf32>
    %cst_23 = arith.constant dense<0.000000e+00> : vector<16xf32>
    %29 = vector.multi_reduction <add>, %9, %cst_23 [1] : vector<16x128xf32> to vector<16xf32>
    %30 = vector.shape_cast %29 : vector<16xf32> to vector<16x1xf32>
    %cst_24 = arith.constant 3.125000e-02 : f32
    %31 = vector.broadcast %cst_24 : f32 to vector<16x1xf32>
    %32 = arith.mulf %30, %31 : vector<16x1xf32>
    %33 = vector.broadcast %32 : vector<16x1xf32> to vector<16x128xf32>
    %34 = arith.subf %9, %33 : vector<16x128xf32>
    %35 = vector.broadcast %4 : vector<1x128xf32> to vector<16x128xf32>
    %36 = arith.mulf %34, %35 : vector<16x128xf32>
    %37 = arith.mulf %36, %36 : vector<16x128xf32>
    %cst_25 = arith.constant dense<0.000000e+00> : vector<16xf32>
    %38 = vector.multi_reduction <add>, %37, %cst_25 [1] : vector<16x128xf32> to vector<16xf32>
    %39 = vector.shape_cast %38 : vector<16xf32> to vector<16x1xf32>
    %cst_26 = arith.constant 3.125000e-02 : f32
    %40 = vector.broadcast %cst_26 : f32 to vector<16x1xf32>
    %41 = arith.mulf %39, %40 : vector<16x1xf32>
    %cst_27 = arith.constant 9.99999997E-7 : f32
    %42 = vector.broadcast %cst_27 : f32 to vector<16x1xf32>
    %43 = arith.addf %41, %42 : vector<16x1xf32>
    %44 = math.rsqrt %43 : vector<16x1xf32>
    %45 = vector.broadcast %44 : vector<16x1xf32> to vector<16x128xf32>
    %46 = arith.mulf %36, %45 : vector<16x128xf32>
    %47 = vector.broadcast %13 : vector<1x128xf32> to vector<16x128xf32>
    %48 = arith.mulf %46, %47 : vector<16x128xf32>
    %49 = vector.broadcast %14 : vector<1x128xf32> to vector<16x128xf32>
    %50 = arith.addf %48, %49 : vector<16x128xf32>
    %cst_28 = arith.constant dense<0.000000e+00> : vector<16x128xf32>
    %51 = tpu.matmul %50, %22, %cst_28 {dimension_numbers = #tpu.dot_dimension_numbers<[1], [0], [0], [1], [0, 0, 1, 1], [], []>} : vector<16x128xf32>, vector<128x128xf32>, vector<16x128xf32> -> vector<16x128xf32>
    %52 = vector.broadcast %15 : vector<1x128xf32> to vector<16x128xf32>
    %53 = arith.addf %51, %52 : vector<16x128xf32>
    %54 = vector.broadcast %16 : vector<1x128xf32> to vector<16x128xf32>
    %55 = arith.addf %9, %54 : vector<16x128xf32>
    %56 = vector.extract_strided_slice %53 {offsets = [0, 0], sizes = [16, 8], strides = [1, 1]} : vector<16x128xf32> to vector<16x8xf32>
    %57 = vector.extract_strided_slice %53 {offsets = [0, 32], sizes = [16, 8], strides = [1, 1]} : vector<16x128xf32> to vector<16x8xf32>
    %58 = vector.extract_strided_slice %53 {offsets = [0, 64], sizes = [16, 8], strides = [1, 1]} : vector<16x128xf32> to vector<16x8xf32>
    %cst_29 = arith.constant dense<0.000000e+00> : vector<16x16xf32>
    %59 = tpu.matmul %56, %57, %cst_29 {dimension_numbers = #tpu.dot_dimension_numbers<[1], [1], [0], [0], [0, 0, 1, 0], [], []>} : vector<16x8xf32>, vector<16x8xf32>, vector<16x16xf32> -> vector<16x16xf32>
    %cst_30 = arith.constant 0.353553385 : f32
    %60 = vector.broadcast %cst_30 : f32 to vector<16x16xf32>
    %61 = arith.mulf %59, %60 : vector<16x16xf32>
    %62 = arith.addf %61, %10 : vector<16x16xf32>
    %cst_31 = arith.constant dense<0xFF800000> : vector<16xf32>
    %63 = vector.multi_reduction <maximumf>, %62, %cst_31 [1] : vector<16x16xf32> to vector<16xf32>
    %64 = vector.shape_cast %63 : vector<16xf32> to vector<16x1xf32>
    %65 = vector.broadcast %64 : vector<16x1xf32> to vector<16x16xf32>
    %66 = arith.subf %62, %65 : vector<16x16xf32>
    %67 = math.exp %66 : vector<16x16xf32>
    %cst_32 = arith.constant dense<0.000000e+00> : vector<16xf32>
    %68 = vector.multi_reduction <add>, %67, %cst_32 [1] : vector<16x16xf32> to vector<16xf32>
    %69 = vector.shape_cast %68 : vector<16xf32> to vector<16x1xf32>
    %70 = vector.broadcast %69 : vector<16x1xf32> to vector<16x16xf32>
    %71 = arith.divf %67, %70 : vector<16x16xf32>
    %cst_33 = arith.constant dense<0.000000e+00> : vector<16x8xf32>
    %72 = tpu.matmul %71, %58, %cst_33 {dimension_numbers = #tpu.dot_dimension_numbers<[1], [0], [0], [1], [0, 0, 1, 1], [], []>} : vector<16x16xf32>, vector<16x8xf32>, vector<16x8xf32> -> vector<16x8xf32>
    %73 = vector.extract_strided_slice %24 {offsets = [0, 0], sizes = [8, 128], strides = [1, 1]} : vector<128x128xf32> to vector<8x128xf32>
    %cst_34 = arith.constant dense<0.000000e+00> : vector<16x128xf32>
    %74 = tpu.matmul %72, %73, %cst_34 {dimension_numbers = #tpu.dot_dimension_numbers<[1], [0], [0], [1], [0, 0, 1, 1], [], []>} : vector<16x8xf32>, vector<8x128xf32>, vector<16x128xf32> -> vector<16x128xf32>
    %75 = arith.addf %55, %74 : vector<16x128xf32>
    %76 = vector.extract_strided_slice %53 {offsets = [0, 8], sizes = [16, 8], strides = [1, 1]} : vector<16x128xf32> to vector<16x8xf32>
    %77 = vector.extract_strided_slice %53 {offsets = [0, 40], sizes = [16, 8], strides = [1, 1]} : vector<16x128xf32> to vector<16x8xf32>
    %78 = vector.extract_strided_slice %53 {offsets = [0, 72], sizes = [16, 8], strides = [1, 1]} : vector<16x128xf32> to vector<16x8xf32>
    %cst_35 = arith.constant dense<0.000000e+00> : vector<16x16xf32>
    %79 = tpu.matmul %76, %77, %cst_35 {dimension_numbers = #tpu.dot_dimension_numbers<[1], [1], [0], [0], [0, 0, 1, 0], [], []>} : vector<16x8xf32>, vector<16x8xf32>, vector<16x16xf32> -> vector<16x16xf32>
    %cst_36 = arith.constant 0.353553385 : f32
    %80 = vector.broadcast %cst_36 : f32 to vector<16x16xf32>
    %81 = arith.mulf %79, %80 : vector<16x16xf32>
    %82 = arith.addf %81, %10 : vector<16x16xf32>
    %cst_37 = arith.constant dense<0xFF800000> : vector<16xf32>
    %83 = vector.multi_reduction <maximumf>, %82, %cst_37 [1] : vector<16x16xf32> to vector<16xf32>
    %84 = vector.shape_cast %83 : vector<16xf32> to vector<16x1xf32>
    %85 = vector.broadcast %84 : vector<16x1xf32> to vector<16x16xf32>
    %86 = arith.subf %82, %85 : vector<16x16xf32>
    %87 = math.exp %86 : vector<16x16xf32>
    %cst_38 = arith.constant dense<0.000000e+00> : vector<16xf32>
    %88 = vector.multi_reduction <add>, %87, %cst_38 [1] : vector<16x16xf32> to vector<16xf32>
    %89 = vector.shape_cast %88 : vector<16xf32> to vector<16x1xf32>
    %90 = vector.broadcast %89 : vector<16x1xf32> to vector<16x16xf32>
    %91 = arith.divf %87, %90 : vector<16x16xf32>
    %cst_39 = arith.constant dense<0.000000e+00> : vector<16x8xf32>
    %92 = tpu.matmul %91, %78, %cst_39 {dimension_numbers = #tpu.dot_dimension_numbers<[1], [0], [0], [1], [0, 0, 1, 1], [], []>} : vector<16x16xf32>, vector<16x8xf32>, vector<16x8xf32> -> vector<16x8xf32>
    %93 = vector.extract_strided_slice %24 {offsets = [8, 0], sizes = [8, 128], strides = [1, 1]} : vector<128x128xf32> to vector<8x128xf32>
    %cst_40 = arith.constant dense<0.000000e+00> : vector<16x128xf32>
    %94 = tpu.matmul %92, %93, %cst_40 {dimension_numbers = #tpu.dot_dimension_numbers<[1], [0], [0], [1], [0, 0, 1, 1], [], []>} : vector<16x8xf32>, vector<8x128xf32>, vector<16x128xf32> -> vector<16x128xf32>
    %95 = arith.addf %75, %94 : vector<16x128xf32>
    %96 = vector.extract_strided_slice %53 {offsets = [0, 16], sizes = [16, 8], strides = [1, 1]} : vector<16x128xf32> to vector<16x8xf32>
    %97 = vector.extract_strided_slice %53 {offsets = [0, 48], sizes = [16, 8], strides = [1, 1]} : vector<16x128xf32> to vector<16x8xf32>
    %98 = vector.extract_strided_slice %53 {offsets = [0, 80], sizes = [16, 8], strides = [1, 1]} : vector<16x128xf32> to vector<16x8xf32>
    %cst_41 = arith.constant dense<0.000000e+00> : vector<16x16xf32>
    %99 = tpu.matmul %96, %97, %cst_41 {dimension_numbers = #tpu.dot_dimension_numbers<[1], [1], [0], [0], [0, 0, 1, 0], [], []>} : vector<16x8xf32>, vector<16x8xf32>, vector<16x16xf32> -> vector<16x16xf32>
    %cst_42 = arith.constant 0.353553385 : f32
    %100 = vector.broadcast %cst_42 : f32 to vector<16x16xf32>
    %101 = arith.mulf %99, %100 : vector<16x16xf32>
    %102 = arith.addf %101, %10 : vector<16x16xf32>
    %cst_43 = arith.constant dense<0xFF800000> : vector<16xf32>
    %103 = vector.multi_reduction <maximumf>, %102, %cst_43 [1] : vector<16x16xf32> to vector<16xf32>
    %104 = vector.shape_cast %103 : vector<16xf32> to vector<16x1xf32>
    %105 = vector.broadcast %104 : vector<16x1xf32> to vector<16x16xf32>
    %106 = arith.subf %102, %105 : vector<16x16xf32>
    %107 = math.exp %106 : vector<16x16xf32>
    %cst_44 = arith.constant dense<0.000000e+00> : vector<16xf32>
    %108 = vector.multi_reduction <add>, %107, %cst_44 [1] : vector<16x16xf32> to vector<16xf32>
    %109 = vector.shape_cast %108 : vector<16xf32> to vector<16x1xf32>
    %110 = vector.broadcast %109 : vector<16x1xf32> to vector<16x16xf32>
    %111 = arith.divf %107, %110 : vector<16x16xf32>
    %cst_45 = arith.constant dense<0.000000e+00> : vector<16x8xf32>
    %112 = tpu.matmul %111, %98, %cst_45 {dimension_numbers = #tpu.dot_dimension_numbers<[1], [0], [0], [1], [0, 0, 1, 1], [], []>} : vector<16x16xf32>, vector<16x8xf32>, vector<16x8xf32> -> vector<16x8xf32>
    %113 = vector.extract_strided_slice %24 {offsets = [16, 0], sizes = [8, 128], strides = [1, 1]} : vector<128x128xf32> to vector<8x128xf32>
    %cst_46 = arith.constant dense<0.000000e+00> : vector<16x128xf32>
    %114 = tpu.matmul %112, %113, %cst_46 {dimension_numbers = #tpu.dot_dimension_numbers<[1], [0], [0], [1], [0, 0, 1, 1], [], []>} : vector<16x8xf32>, vector<8x128xf32>, vector<16x128xf32> -> vector<16x128xf32>
    %115 = arith.addf %95, %114 : vector<16x128xf32>
    %116 = vector.extract_strided_slice %53 {offsets = [0, 24], sizes = [16, 8], strides = [1, 1]} : vector<16x128xf32> to vector<16x8xf32>
    %117 = vector.extract_strided_slice %53 {offsets = [0, 56], sizes = [16, 8], strides = [1, 1]} : vector<16x128xf32> to vector<16x8xf32>
    %118 = vector.extract_strided_slice %53 {offsets = [0, 88], sizes = [16, 8], strides = [1, 1]} : vector<16x128xf32> to vector<16x8xf32>
    %cst_47 = arith.constant dense<0.000000e+00> : vector<16x16xf32>
    %119 = tpu.matmul %116, %117, %cst_47 {dimension_numbers = #tpu.dot_dimension_numbers<[1], [1], [0], [0], [0, 0, 1, 0], [], []>} : vector<16x8xf32>, vector<16x8xf32>, vector<16x16xf32> -> vector<16x16xf32>
    %cst_48 = arith.constant 0.353553385 : f32
    %120 = vector.broadcast %cst_48 : f32 to vector<16x16xf32>
    %121 = arith.mulf %119, %120 : vector<16x16xf32>
    %122 = arith.addf %121, %10 : vector<16x16xf32>
    %cst_49 = arith.constant dense<0xFF800000> : vector<16xf32>
    %123 = vector.multi_reduction <maximumf>, %122, %cst_49 [1] : vector<16x16xf32> to vector<16xf32>
    %124 = vector.shape_cast %123 : vector<16xf32> to vector<16x1xf32>
    %125 = vector.broadcast %124 : vector<16x1xf32> to vector<16x16xf32>
    %126 = arith.subf %122, %125 : vector<16x16xf32>
    %127 = math.exp %126 : vector<16x16xf32>
    %cst_50 = arith.constant dense<0.000000e+00> : vector<16xf32>
    %128 = vector.multi_reduction <add>, %127, %cst_50 [1] : vector<16x16xf32> to vector<16xf32>
    %129 = vector.shape_cast %128 : vector<16xf32> to vector<16x1xf32>
    %130 = vector.broadcast %129 : vector<16x1xf32> to vector<16x16xf32>
    %131 = arith.divf %127, %130 : vector<16x16xf32>
    %cst_51 = arith.constant dense<0.000000e+00> : vector<16x8xf32>
    %132 = tpu.matmul %131, %118, %cst_51 {dimension_numbers = #tpu.dot_dimension_numbers<[1], [0], [0], [1], [0, 0, 1, 1], [], []>} : vector<16x16xf32>, vector<16x8xf32>, vector<16x8xf32> -> vector<16x8xf32>
    %133 = vector.extract_strided_slice %24 {offsets = [24, 0], sizes = [8, 128], strides = [1, 1]} : vector<128x128xf32> to vector<8x128xf32>
    %cst_52 = arith.constant dense<0.000000e+00> : vector<16x128xf32>
    %134 = tpu.matmul %132, %133, %cst_52 {dimension_numbers = #tpu.dot_dimension_numbers<[1], [0], [0], [1], [0, 0, 1, 1], [], []>} : vector<16x8xf32>, vector<8x128xf32>, vector<16x128xf32> -> vector<16x128xf32>
    %135 = arith.addf %115, %134 : vector<16x128xf32>
    %cst_53 = arith.constant dense<0.000000e+00> : vector<16xf32>
    %136 = vector.multi_reduction <add>, %135, %cst_53 [1] : vector<16x128xf32> to vector<16xf32>
    %137 = vector.shape_cast %136 : vector<16xf32> to vector<16x1xf32>
    %cst_54 = arith.constant 3.125000e-02 : f32
    %138 = vector.broadcast %cst_54 : f32 to vector<16x1xf32>
    %139 = arith.mulf %137, %138 : vector<16x1xf32>
    %140 = vector.broadcast %139 : vector<16x1xf32> to vector<16x128xf32>
    %141 = arith.subf %135, %140 : vector<16x128xf32>
    %142 = vector.broadcast %4 : vector<1x128xf32> to vector<16x128xf32>
    %143 = arith.mulf %141, %142 : vector<16x128xf32>
    %144 = arith.mulf %143, %143 : vector<16x128xf32>
    %cst_55 = arith.constant dense<0.000000e+00> : vector<16xf32>
    %145 = vector.multi_reduction <add>, %144, %cst_55 [1] : vector<16x128xf32> to vector<16xf32>
    %146 = vector.shape_cast %145 : vector<16xf32> to vector<16x1xf32>
    %cst_56 = arith.constant 3.125000e-02 : f32
    %147 = vector.broadcast %cst_56 : f32 to vector<16x1xf32>
    %148 = arith.mulf %146, %147 : vector<16x1xf32>
    %cst_57 = arith.constant 9.99999997E-7 : f32
    %149 = vector.broadcast %cst_57 : f32 to vector<16x1xf32>
    %150 = arith.addf %148, %149 : vector<16x1xf32>
    %151 = math.rsqrt %150 : vector<16x1xf32>
    %152 = vector.broadcast %151 : vector<16x1xf32> to vector<16x128xf32>
    %153 = arith.mulf %143, %152 : vector<16x128xf32>
    %154 = vector.broadcast %17 : vector<1x128xf32> to vector<16x128xf32>
    %155 = arith.mulf %153, %154 : vector<16x128xf32>
    %156 = vector.broadcast %18 : vector<1x128xf32> to vector<16x128xf32>
    %157 = arith.addf %155, %156 : vector<16x128xf32>
    %cst_58 = arith.constant dense<0.000000e+00> : vector<16x128xf32>
    %158 = tpu.matmul %157, %26, %cst_58 {dimension_numbers = #tpu.dot_dimension_numbers<[1], [0], [0], [1], [0, 0, 1, 1], [], []>} : vector<16x128xf32>, vector<128x128xf32>, vector<16x128xf32> -> vector<16x128xf32>
    %159 = vector.broadcast %19 : vector<1x128xf32> to vector<16x128xf32>
    %160 = arith.addf %158, %159 : vector<16x128xf32>
    %161 = math.absf %160 : vector<16x128xf32>
    %cst_59 = arith.constant 0.707106769 : f32
    %162 = vector.broadcast %cst_59 : f32 to vector<16x128xf32>
    %163 = arith.mulf %161, %162 : vector<16x128xf32>
    %cst_60 = arith.constant 0.327591091 : f32
    %164 = vector.broadcast %cst_60 : f32 to vector<16x128xf32>
    %165 = arith.mulf %164, %163 : vector<16x128xf32>
    %cst_61 = arith.constant 1.000000e+00 : f32
    %166 = vector.broadcast %cst_61 : f32 to vector<16x128xf32>
    %167 = arith.addf %166, %165 : vector<16x128xf32>
    %cst_62 = arith.constant 1.000000e+00 : f32
    %168 = vector.broadcast %cst_62 : f32 to vector<16x128xf32>
    %169 = arith.divf %168, %167 : vector<16x128xf32>
    %cst_63 = arith.constant 1.06140542 : f32
    %170 = vector.broadcast %cst_63 : f32 to vector<16x128xf32>
    %171 = arith.mulf %169, %170 : vector<16x128xf32>
    %cst_64 = arith.constant -1.45315206 : f32
    %172 = vector.broadcast %cst_64 : f32 to vector<16x128xf32>
    %173 = arith.addf %172, %171 : vector<16x128xf32>
    %174 = arith.mulf %169, %173 : vector<16x128xf32>
    %cst_65 = arith.constant 1.42141378 : f32
    %175 = vector.broadcast %cst_65 : f32 to vector<16x128xf32>
    %176 = arith.addf %175, %174 : vector<16x128xf32>
    %177 = arith.mulf %169, %176 : vector<16x128xf32>
    %cst_66 = arith.constant -0.284496725 : f32
    %178 = vector.broadcast %cst_66 : f32 to vector<16x128xf32>
    %179 = arith.addf %178, %177 : vector<16x128xf32>
    %180 = arith.mulf %169, %179 : vector<16x128xf32>
    %cst_67 = arith.constant 0.254829586 : f32
    %181 = vector.broadcast %cst_67 : f32 to vector<16x128xf32>
    %182 = arith.addf %181, %180 : vector<16x128xf32>
    %183 = arith.mulf %169, %182 : vector<16x128xf32>
    %184 = arith.mulf %163, %163 : vector<16x128xf32>
    %cst_68 = arith.constant 0.000000e+00 : f32
    %185 = vector.broadcast %cst_68 : f32 to vector<16x128xf32>
    %186 = arith.subf %185, %184 : vector<16x128xf32>
    %187 = math.exp %186 : vector<16x128xf32>
    %188 = arith.mulf %183, %187 : vector<16x128xf32>
    %cst_69 = arith.constant 1.000000e+00 : f32
    %189 = vector.broadcast %cst_69 : f32 to vector<16x128xf32>
    %190 = arith.subf %189, %188 : vector<16x128xf32>
    %cst_70 = arith.constant 0.000000e+00 : f32
    %191 = vector.broadcast %cst_70 : f32 to vector<16x128xf32>
    %192 = arith.cmpf olt, %160, %191 : vector<16x128xf32>
    %cst_71 = arith.constant 0.000000e+00 : f32
    %193 = vector.broadcast %cst_71 : f32 to vector<16x128xf32>
    %194 = arith.subf %193, %190 : vector<16x128xf32>
    %195 = arith.select %192, %194, %190 : vector<16x128xi1>, vector<16x128xf32>
    %cst_72 = arith.constant 5.000000e-01 : f32
    %196 = vector.broadcast %cst_72 : f32 to vector<16x128xf32>
    %197 = arith.mulf %196, %160 : vector<16x128xf32>
    %cst_73 = arith.constant 1.000000e+00 : f32
    %198 = vector.broadcast %cst_73 : f32 to vector<16x128xf32>
    %199 = arith.addf %198, %195 : vector<16x128xf32>
    %200 = arith.mulf %197, %199 : vector<16x128xf32>
    %cst_74 = arith.constant dense<0.000000e+00> : vector<16x128xf32>
    %201 = tpu.matmul %200, %28, %cst_74 {dimension_numbers = #tpu.dot_dimension_numbers<[1], [0], [0], [1], [0, 0, 1, 1], [], []>} : vector<16x128xf32>, vector<128x128xf32>, vector<16x128xf32> -> vector<16x128xf32>
    %202 = vector.broadcast %20 : vector<1x128xf32> to vector<16x128xf32>
    %203 = arith.addf %201, %202 : vector<16x128xf32>
    %204 = arith.addf %203, %135 : vector<16x128xf32>
    %c1_75 = arith.constant 1 : index
    %c0_76 = arith.constant 0 : index
    %c0_77 = arith.constant 0 : index
    %205 = vector.load %arg5[%c1_75, %c0_76, %c0_77] : memref<2x8x128xf32, #tpu.memory_space<vmem>>, vector<1x8x128xf32>
    %206 = vector.shape_cast %205 : vector<1x8x128xf32> to vector<8x128xf32>
    %207 = vector.extract_strided_slice %206 {offsets = [0, 0], sizes = [1, 128], strides = [1, 1]} : vector<8x128xf32> to vector<1x128xf32>
    %208 = vector.extract_strided_slice %206 {offsets = [1, 0], sizes = [1, 128], strides = [1, 1]} : vector<8x128xf32> to vector<1x128xf32>
    %209 = vector.extract_strided_slice %206 {offsets = [2, 0], sizes = [1, 128], strides = [1, 1]} : vector<8x128xf32> to vector<1x128xf32>
    %210 = vector.extract_strided_slice %206 {offsets = [3, 0], sizes = [1, 128], strides = [1, 1]} : vector<8x128xf32> to vector<1x128xf32>
    %211 = vector.extract_strided_slice %206 {offsets = [4, 0], sizes = [1, 128], strides = [1, 1]} : vector<8x128xf32> to vector<1x128xf32>
    %212 = vector.extract_strided_slice %206 {offsets = [5, 0], sizes = [1, 128], strides = [1, 1]} : vector<8x128xf32> to vector<1x128xf32>
    %213 = vector.extract_strided_slice %206 {offsets = [6, 0], sizes = [1, 128], strides = [1, 1]} : vector<8x128xf32> to vector<1x128xf32>
    %214 = vector.extract_strided_slice %206 {offsets = [7, 0], sizes = [1, 128], strides = [1, 1]} : vector<8x128xf32> to vector<1x128xf32>
    %c1_78 = arith.constant 1 : index
    %c0_79 = arith.constant 0 : index
    %c0_80 = arith.constant 0 : index
    %c0_81 = arith.constant 0 : index
    %215 = vector.load %arg4[%c1_78, %c0_79, %c0_80, %c0_81] : memref<2x4x128x128xf32, #tpu.memory_space<vmem>>, vector<1x1x128x128xf32>
    %216 = vector.shape_cast %215 : vector<1x1x128x128xf32> to vector<128x128xf32>
    %c1_82 = arith.constant 1 : index
    %c1_83 = arith.constant 1 : index
    %c0_84 = arith.constant 0 : index
    %c0_85 = arith.constant 0 : index
    %217 = vector.load %arg4[%c1_82, %c1_83, %c0_84, %c0_85] : memref<2x4x128x128xf32, #tpu.memory_space<vmem>>, vector<1x1x128x128xf32>
    %218 = vector.shape_cast %217 : vector<1x1x128x128xf32> to vector<128x128xf32>
    %c1_86 = arith.constant 1 : index
    %c2_87 = arith.constant 2 : index
    %c0_88 = arith.constant 0 : index
    %c0_89 = arith.constant 0 : index
    %219 = vector.load %arg4[%c1_86, %c2_87, %c0_88, %c0_89] : memref<2x4x128x128xf32, #tpu.memory_space<vmem>>, vector<1x1x128x128xf32>
    %220 = vector.shape_cast %219 : vector<1x1x128x128xf32> to vector<128x128xf32>
    %c1_90 = arith.constant 1 : index
    %c3_91 = arith.constant 3 : index
    %c0_92 = arith.constant 0 : index
    %c0_93 = arith.constant 0 : index
    %221 = vector.load %arg4[%c1_90, %c3_91, %c0_92, %c0_93] : memref<2x4x128x128xf32, #tpu.memory_space<vmem>>, vector<1x1x128x128xf32>
    %222 = vector.shape_cast %221 : vector<1x1x128x128xf32> to vector<128x128xf32>
    %cst_94 = arith.constant dense<0.000000e+00> : vector<16xf32>
    %223 = vector.multi_reduction <add>, %204, %cst_94 [1] : vector<16x128xf32> to vector<16xf32>
    %224 = vector.shape_cast %223 : vector<16xf32> to vector<16x1xf32>
    %cst_95 = arith.constant 3.125000e-02 : f32
    %225 = vector.broadcast %cst_95 : f32 to vector<16x1xf32>
    %226 = arith.mulf %224, %225 : vector<16x1xf32>
    %227 = vector.broadcast %226 : vector<16x1xf32> to vector<16x128xf32>
    %228 = arith.subf %204, %227 : vector<16x128xf32>
    %229 = vector.broadcast %4 : vector<1x128xf32> to vector<16x128xf32>
    %230 = arith.mulf %228, %229 : vector<16x128xf32>
    %231 = arith.mulf %230, %230 : vector<16x128xf32>
    %cst_96 = arith.constant dense<0.000000e+00> : vector<16xf32>
    %232 = vector.multi_reduction <add>, %231, %cst_96 [1] : vector<16x128xf32> to vector<16xf32>
    %233 = vector.shape_cast %232 : vector<16xf32> to vector<16x1xf32>
    %cst_97 = arith.constant 3.125000e-02 : f32
    %234 = vector.broadcast %cst_97 : f32 to vector<16x1xf32>
    %235 = arith.mulf %233, %234 : vector<16x1xf32>
    %cst_98 = arith.constant 9.99999997E-7 : f32
    %236 = vector.broadcast %cst_98 : f32 to vector<16x1xf32>
    %237 = arith.addf %235, %236 : vector<16x1xf32>
    %238 = math.rsqrt %237 : vector<16x1xf32>
    %239 = vector.broadcast %238 : vector<16x1xf32> to vector<16x128xf32>
    %240 = arith.mulf %230, %239 : vector<16x128xf32>
    %241 = vector.broadcast %207 : vector<1x128xf32> to vector<16x128xf32>
    %242 = arith.mulf %240, %241 : vector<16x128xf32>
    %243 = vector.broadcast %208 : vector<1x128xf32> to vector<16x128xf32>
    %244 = arith.addf %242, %243 : vector<16x128xf32>
    %cst_99 = arith.constant dense<0.000000e+00> : vector<16x128xf32>
    %245 = tpu.matmul %244, %216, %cst_99 {dimension_numbers = #tpu.dot_dimension_numbers<[1], [0], [0], [1], [0, 0, 1, 1], [], []>} : vector<16x128xf32>, vector<128x128xf32>, vector<16x128xf32> -> vector<16x128xf32>
    %246 = vector.broadcast %209 : vector<1x128xf32> to vector<16x128xf32>
    %247 = arith.addf %245, %246 : vector<16x128xf32>
    %248 = vector.broadcast %210 : vector<1x128xf32> to vector<16x128xf32>
    %249 = arith.addf %204, %248 : vector<16x128xf32>
    %250 = vector.extract_strided_slice %247 {offsets = [0, 0], sizes = [16, 8], strides = [1, 1]} : vector<16x128xf32> to vector<16x8xf32>
    %251 = vector.extract_strided_slice %247 {offsets = [0, 32], sizes = [16, 8], strides = [1, 1]} : vector<16x128xf32> to vector<16x8xf32>
    %252 = vector.extract_strided_slice %247 {offsets = [0, 64], sizes = [16, 8], strides = [1, 1]} : vector<16x128xf32> to vector<16x8xf32>
    %cst_100 = arith.constant dense<0.000000e+00> : vector<16x16xf32>
    %253 = tpu.matmul %250, %251, %cst_100 {dimension_numbers = #tpu.dot_dimension_numbers<[1], [1], [0], [0], [0, 0, 1, 0], [], []>} : vector<16x8xf32>, vector<16x8xf32>, vector<16x16xf32> -> vector<16x16xf32>
    %cst_101 = arith.constant 0.353553385 : f32
    %254 = vector.broadcast %cst_101 : f32 to vector<16x16xf32>
    %255 = arith.mulf %253, %254 : vector<16x16xf32>
    %256 = arith.addf %255, %10 : vector<16x16xf32>
    %cst_102 = arith.constant dense<0xFF800000> : vector<16xf32>
    %257 = vector.multi_reduction <maximumf>, %256, %cst_102 [1] : vector<16x16xf32> to vector<16xf32>
    %258 = vector.shape_cast %257 : vector<16xf32> to vector<16x1xf32>
    %259 = vector.broadcast %258 : vector<16x1xf32> to vector<16x16xf32>
    %260 = arith.subf %256, %259 : vector<16x16xf32>
    %261 = math.exp %260 : vector<16x16xf32>
    %cst_103 = arith.constant dense<0.000000e+00> : vector<16xf32>
    %262 = vector.multi_reduction <add>, %261, %cst_103 [1] : vector<16x16xf32> to vector<16xf32>
    %263 = vector.shape_cast %262 : vector<16xf32> to vector<16x1xf32>
    %264 = vector.broadcast %263 : vector<16x1xf32> to vector<16x16xf32>
    %265 = arith.divf %261, %264 : vector<16x16xf32>
    %cst_104 = arith.constant dense<0.000000e+00> : vector<16x8xf32>
    %266 = tpu.matmul %265, %252, %cst_104 {dimension_numbers = #tpu.dot_dimension_numbers<[1], [0], [0], [1], [0, 0, 1, 1], [], []>} : vector<16x16xf32>, vector<16x8xf32>, vector<16x8xf32> -> vector<16x8xf32>
    %267 = vector.extract_strided_slice %218 {offsets = [0, 0], sizes = [8, 128], strides = [1, 1]} : vector<128x128xf32> to vector<8x128xf32>
    %cst_105 = arith.constant dense<0.000000e+00> : vector<16x128xf32>
    %268 = tpu.matmul %266, %267, %cst_105 {dimension_numbers = #tpu.dot_dimension_numbers<[1], [0], [0], [1], [0, 0, 1, 1], [], []>} : vector<16x8xf32>, vector<8x128xf32>, vector<16x128xf32> -> vector<16x128xf32>
    %269 = arith.addf %249, %268 : vector<16x128xf32>
    %270 = vector.extract_strided_slice %247 {offsets = [0, 8], sizes = [16, 8], strides = [1, 1]} : vector<16x128xf32> to vector<16x8xf32>
    %271 = vector.extract_strided_slice %247 {offsets = [0, 40], sizes = [16, 8], strides = [1, 1]} : vector<16x128xf32> to vector<16x8xf32>
    %272 = vector.extract_strided_slice %247 {offsets = [0, 72], sizes = [16, 8], strides = [1, 1]} : vector<16x128xf32> to vector<16x8xf32>
    %cst_106 = arith.constant dense<0.000000e+00> : vector<16x16xf32>
    %273 = tpu.matmul %270, %271, %cst_106 {dimension_numbers = #tpu.dot_dimension_numbers<[1], [1], [0], [0], [0, 0, 1, 0], [], []>} : vector<16x8xf32>, vector<16x8xf32>, vector<16x16xf32> -> vector<16x16xf32>
    %cst_107 = arith.constant 0.353553385 : f32
    %274 = vector.broadcast %cst_107 : f32 to vector<16x16xf32>
    %275 = arith.mulf %273, %274 : vector<16x16xf32>
    %276 = arith.addf %275, %10 : vector<16x16xf32>
    %cst_108 = arith.constant dense<0xFF800000> : vector<16xf32>
    %277 = vector.multi_reduction <maximumf>, %276, %cst_108 [1] : vector<16x16xf32> to vector<16xf32>
    %278 = vector.shape_cast %277 : vector<16xf32> to vector<16x1xf32>
    %279 = vector.broadcast %278 : vector<16x1xf32> to vector<16x16xf32>
    %280 = arith.subf %276, %279 : vector<16x16xf32>
    %281 = math.exp %280 : vector<16x16xf32>
    %cst_109 = arith.constant dense<0.000000e+00> : vector<16xf32>
    %282 = vector.multi_reduction <add>, %281, %cst_109 [1] : vector<16x16xf32> to vector<16xf32>
    %283 = vector.shape_cast %282 : vector<16xf32> to vector<16x1xf32>
    %284 = vector.broadcast %283 : vector<16x1xf32> to vector<16x16xf32>
    %285 = arith.divf %281, %284 : vector<16x16xf32>
    %cst_110 = arith.constant dense<0.000000e+00> : vector<16x8xf32>
    %286 = tpu.matmul %285, %272, %cst_110 {dimension_numbers = #tpu.dot_dimension_numbers<[1], [0], [0], [1], [0, 0, 1, 1], [], []>} : vector<16x16xf32>, vector<16x8xf32>, vector<16x8xf32> -> vector<16x8xf32>
    %287 = vector.extract_strided_slice %218 {offsets = [8, 0], sizes = [8, 128], strides = [1, 1]} : vector<128x128xf32> to vector<8x128xf32>
    %cst_111 = arith.constant dense<0.000000e+00> : vector<16x128xf32>
    %288 = tpu.matmul %286, %287, %cst_111 {dimension_numbers = #tpu.dot_dimension_numbers<[1], [0], [0], [1], [0, 0, 1, 1], [], []>} : vector<16x8xf32>, vector<8x128xf32>, vector<16x128xf32> -> vector<16x128xf32>
    %289 = arith.addf %269, %288 : vector<16x128xf32>
    %290 = vector.extract_strided_slice %247 {offsets = [0, 16], sizes = [16, 8], strides = [1, 1]} : vector<16x128xf32> to vector<16x8xf32>
    %291 = vector.extract_strided_slice %247 {offsets = [0, 48], sizes = [16, 8], strides = [1, 1]} : vector<16x128xf32> to vector<16x8xf32>
    %292 = vector.extract_strided_slice %247 {offsets = [0, 80], sizes = [16, 8], strides = [1, 1]} : vector<16x128xf32> to vector<16x8xf32>
    %cst_112 = arith.constant dense<0.000000e+00> : vector<16x16xf32>
    %293 = tpu.matmul %290, %291, %cst_112 {dimension_numbers = #tpu.dot_dimension_numbers<[1], [1], [0], [0], [0, 0, 1, 0], [], []>} : vector<16x8xf32>, vector<16x8xf32>, vector<16x16xf32> -> vector<16x16xf32>
    %cst_113 = arith.constant 0.353553385 : f32
    %294 = vector.broadcast %cst_113 : f32 to vector<16x16xf32>
    %295 = arith.mulf %293, %294 : vector<16x16xf32>
    %296 = arith.addf %295, %10 : vector<16x16xf32>
    %cst_114 = arith.constant dense<0xFF800000> : vector<16xf32>
    %297 = vector.multi_reduction <maximumf>, %296, %cst_114 [1] : vector<16x16xf32> to vector<16xf32>
    %298 = vector.shape_cast %297 : vector<16xf32> to vector<16x1xf32>
    %299 = vector.broadcast %298 : vector<16x1xf32> to vector<16x16xf32>
    %300 = arith.subf %296, %299 : vector<16x16xf32>
    %301 = math.exp %300 : vector<16x16xf32>
    %cst_115 = arith.constant dense<0.000000e+00> : vector<16xf32>
    %302 = vector.multi_reduction <add>, %301, %cst_115 [1] : vector<16x16xf32> to vector<16xf32>
    %303 = vector.shape_cast %302 : vector<16xf32> to vector<16x1xf32>
    %304 = vector.broadcast %303 : vector<16x1xf32> to vector<16x16xf32>
    %305 = arith.divf %301, %304 : vector<16x16xf32>
    %cst_116 = arith.constant dense<0.000000e+00> : vector<16x8xf32>
    %306 = tpu.matmul %305, %292, %cst_116 {dimension_numbers = #tpu.dot_dimension_numbers<[1], [0], [0], [1], [0, 0, 1, 1], [], []>} : vector<16x16xf32>, vector<16x8xf32>, vector<16x8xf32> -> vector<16x8xf32>
    %307 = vector.extract_strided_slice %218 {offsets = [16, 0], sizes = [8, 128], strides = [1, 1]} : vector<128x128xf32> to vector<8x128xf32>
    %cst_117 = arith.constant dense<0.000000e+00> : vector<16x128xf32>
    %308 = tpu.matmul %306, %307, %cst_117 {dimension_numbers = #tpu.dot_dimension_numbers<[1], [0], [0], [1], [0, 0, 1, 1], [], []>} : vector<16x8xf32>, vector<8x128xf32>, vector<16x128xf32> -> vector<16x128xf32>
    %309 = arith.addf %289, %308 : vector<16x128xf32>
    %310 = vector.extract_strided_slice %247 {offsets = [0, 24], sizes = [16, 8], strides = [1, 1]} : vector<16x128xf32> to vector<16x8xf32>
    %311 = vector.extract_strided_slice %247 {offsets = [0, 56], sizes = [16, 8], strides = [1, 1]} : vector<16x128xf32> to vector<16x8xf32>
    %312 = vector.extract_strided_slice %247 {offsets = [0, 88], sizes = [16, 8], strides = [1, 1]} : vector<16x128xf32> to vector<16x8xf32>
    %cst_118 = arith.constant dense<0.000000e+00> : vector<16x16xf32>
    %313 = tpu.matmul %310, %311, %cst_118 {dimension_numbers = #tpu.dot_dimension_numbers<[1], [1], [0], [0], [0, 0, 1, 0], [], []>} : vector<16x8xf32>, vector<16x8xf32>, vector<16x16xf32> -> vector<16x16xf32>
    %cst_119 = arith.constant 0.353553385 : f32
    %314 = vector.broadcast %cst_119 : f32 to vector<16x16xf32>
    %315 = arith.mulf %313, %314 : vector<16x16xf32>
    %316 = arith.addf %315, %10 : vector<16x16xf32>
    %cst_120 = arith.constant dense<0xFF800000> : vector<16xf32>
    %317 = vector.multi_reduction <maximumf>, %316, %cst_120 [1] : vector<16x16xf32> to vector<16xf32>
    %318 = vector.shape_cast %317 : vector<16xf32> to vector<16x1xf32>
    %319 = vector.broadcast %318 : vector<16x1xf32> to vector<16x16xf32>
    %320 = arith.subf %316, %319 : vector<16x16xf32>
    %321 = math.exp %320 : vector<16x16xf32>
    %cst_121 = arith.constant dense<0.000000e+00> : vector<16xf32>
    %322 = vector.multi_reduction <add>, %321, %cst_121 [1] : vector<16x16xf32> to vector<16xf32>
    %323 = vector.shape_cast %322 : vector<16xf32> to vector<16x1xf32>
    %324 = vector.broadcast %323 : vector<16x1xf32> to vector<16x16xf32>
    %325 = arith.divf %321, %324 : vector<16x16xf32>
    %cst_122 = arith.constant dense<0.000000e+00> : vector<16x8xf32>
    %326 = tpu.matmul %325, %312, %cst_122 {dimension_numbers = #tpu.dot_dimension_numbers<[1], [0], [0], [1], [0, 0, 1, 1], [], []>} : vector<16x16xf32>, vector<16x8xf32>, vector<16x8xf32> -> vector<16x8xf32>
    %327 = vector.extract_strided_slice %218 {offsets = [24, 0], sizes = [8, 128], strides = [1, 1]} : vector<128x128xf32> to vector<8x128xf32>
    %cst_123 = arith.constant dense<0.000000e+00> : vector<16x128xf32>
    %328 = tpu.matmul %326, %327, %cst_123 {dimension_numbers = #tpu.dot_dimension_numbers<[1], [0], [0], [1], [0, 0, 1, 1], [], []>} : vector<16x8xf32>, vector<8x128xf32>, vector<16x128xf32> -> vector<16x128xf32>
    %329 = arith.addf %309, %328 : vector<16x128xf32>
    %cst_124 = arith.constant dense<0.000000e+00> : vector<16xf32>
    %330 = vector.multi_reduction <add>, %329, %cst_124 [1] : vector<16x128xf32> to vector<16xf32>
    %331 = vector.shape_cast %330 : vector<16xf32> to vector<16x1xf32>
    %cst_125 = arith.constant 3.125000e-02 : f32
    %332 = vector.broadcast %cst_125 : f32 to vector<16x1xf32>
    %333 = arith.mulf %331, %332 : vector<16x1xf32>
    %334 = vector.broadcast %333 : vector<16x1xf32> to vector<16x128xf32>
    %335 = arith.subf %329, %334 : vector<16x128xf32>
    %336 = vector.broadcast %4 : vector<1x128xf32> to vector<16x128xf32>
    %337 = arith.mulf %335, %336 : vector<16x128xf32>
    %338 = arith.mulf %337, %337 : vector<16x128xf32>
    %cst_126 = arith.constant dense<0.000000e+00> : vector<16xf32>
    %339 = vector.multi_reduction <add>, %338, %cst_126 [1] : vector<16x128xf32> to vector<16xf32>
    %340 = vector.shape_cast %339 : vector<16xf32> to vector<16x1xf32>
    %cst_127 = arith.constant 3.125000e-02 : f32
    %341 = vector.broadcast %cst_127 : f32 to vector<16x1xf32>
    %342 = arith.mulf %340, %341 : vector<16x1xf32>
    %cst_128 = arith.constant 9.99999997E-7 : f32
    %343 = vector.broadcast %cst_128 : f32 to vector<16x1xf32>
    %344 = arith.addf %342, %343 : vector<16x1xf32>
    %345 = math.rsqrt %344 : vector<16x1xf32>
    %346 = vector.broadcast %345 : vector<16x1xf32> to vector<16x128xf32>
    %347 = arith.mulf %337, %346 : vector<16x128xf32>
    %348 = vector.broadcast %211 : vector<1x128xf32> to vector<16x128xf32>
    %349 = arith.mulf %347, %348 : vector<16x128xf32>
    %350 = vector.broadcast %212 : vector<1x128xf32> to vector<16x128xf32>
    %351 = arith.addf %349, %350 : vector<16x128xf32>
    %cst_129 = arith.constant dense<0.000000e+00> : vector<16x128xf32>
    %352 = tpu.matmul %351, %220, %cst_129 {dimension_numbers = #tpu.dot_dimension_numbers<[1], [0], [0], [1], [0, 0, 1, 1], [], []>} : vector<16x128xf32>, vector<128x128xf32>, vector<16x128xf32> -> vector<16x128xf32>
    %353 = vector.broadcast %213 : vector<1x128xf32> to vector<16x128xf32>
    %354 = arith.addf %352, %353 : vector<16x128xf32>
    %355 = math.absf %354 : vector<16x128xf32>
    %cst_130 = arith.constant 0.707106769 : f32
    %356 = vector.broadcast %cst_130 : f32 to vector<16x128xf32>
    %357 = arith.mulf %355, %356 : vector<16x128xf32>
    %cst_131 = arith.constant 0.327591091 : f32
    %358 = vector.broadcast %cst_131 : f32 to vector<16x128xf32>
    %359 = arith.mulf %358, %357 : vector<16x128xf32>
    %cst_132 = arith.constant 1.000000e+00 : f32
    %360 = vector.broadcast %cst_132 : f32 to vector<16x128xf32>
    %361 = arith.addf %360, %359 : vector<16x128xf32>
    %cst_133 = arith.constant 1.000000e+00 : f32
    %362 = vector.broadcast %cst_133 : f32 to vector<16x128xf32>
    %363 = arith.divf %362, %361 : vector<16x128xf32>
    %cst_134 = arith.constant 1.06140542 : f32
    %364 = vector.broadcast %cst_134 : f32 to vector<16x128xf32>
    %365 = arith.mulf %363, %364 : vector<16x128xf32>
    %cst_135 = arith.constant -1.45315206 : f32
    %366 = vector.broadcast %cst_135 : f32 to vector<16x128xf32>
    %367 = arith.addf %366, %365 : vector<16x128xf32>
    %368 = arith.mulf %363, %367 : vector<16x128xf32>
    %cst_136 = arith.constant 1.42141378 : f32
    %369 = vector.broadcast %cst_136 : f32 to vector<16x128xf32>
    %370 = arith.addf %369, %368 : vector<16x128xf32>
    %371 = arith.mulf %363, %370 : vector<16x128xf32>
    %cst_137 = arith.constant -0.284496725 : f32
    %372 = vector.broadcast %cst_137 : f32 to vector<16x128xf32>
    %373 = arith.addf %372, %371 : vector<16x128xf32>
    %374 = arith.mulf %363, %373 : vector<16x128xf32>
    %cst_138 = arith.constant 0.254829586 : f32
    %375 = vector.broadcast %cst_138 : f32 to vector<16x128xf32>
    %376 = arith.addf %375, %374 : vector<16x128xf32>
    %377 = arith.mulf %363, %376 : vector<16x128xf32>
    %378 = arith.mulf %357, %357 : vector<16x128xf32>
    %cst_139 = arith.constant 0.000000e+00 : f32
    %379 = vector.broadcast %cst_139 : f32 to vector<16x128xf32>
    %380 = arith.subf %379, %378 : vector<16x128xf32>
    %381 = math.exp %380 : vector<16x128xf32>
    %382 = arith.mulf %377, %381 : vector<16x128xf32>
    %cst_140 = arith.constant 1.000000e+00 : f32
    %383 = vector.broadcast %cst_140 : f32 to vector<16x128xf32>
    %384 = arith.subf %383, %382 : vector<16x128xf32>
    %cst_141 = arith.constant 0.000000e+00 : f32
    %385 = vector.broadcast %cst_141 : f32 to vector<16x128xf32>
    %386 = arith.cmpf olt, %354, %385 : vector<16x128xf32>
    %cst_142 = arith.constant 0.000000e+00 : f32
    %387 = vector.broadcast %cst_142 : f32 to vector<16x128xf32>
    %388 = arith.subf %387, %384 : vector<16x128xf32>
    %389 = arith.select %386, %388, %384 : vector<16x128xi1>, vector<16x128xf32>
    %cst_143 = arith.constant 5.000000e-01 : f32
    %390 = vector.broadcast %cst_143 : f32 to vector<16x128xf32>
    %391 = arith.mulf %390, %354 : vector<16x128xf32>
    %cst_144 = arith.constant 1.000000e+00 : f32
    %392 = vector.broadcast %cst_144 : f32 to vector<16x128xf32>
    %393 = arith.addf %392, %389 : vector<16x128xf32>
    %394 = arith.mulf %391, %393 : vector<16x128xf32>
    %cst_145 = arith.constant dense<0.000000e+00> : vector<16x128xf32>
    %395 = tpu.matmul %394, %222, %cst_145 {dimension_numbers = #tpu.dot_dimension_numbers<[1], [0], [0], [1], [0, 0, 1, 1], [], []>} : vector<16x128xf32>, vector<128x128xf32>, vector<16x128xf32> -> vector<16x128xf32>
    %396 = vector.broadcast %214 : vector<1x128xf32> to vector<16x128xf32>
    %397 = arith.addf %395, %396 : vector<16x128xf32>
    %398 = arith.addf %397, %329 : vector<16x128xf32>
    %c0_146 = arith.constant 0 : index
    %c0_147 = arith.constant 0 : index
    %399 = vector.load %arg6[%c0_146, %c0_147] : memref<16x128xf32, #tpu.memory_space<vmem>>, vector<16x128xf32>
    tpu.vector_store %arg6[%c0_146, %c0_147], %398 {strides = array<i32>} : memref<16x128xf32, #tpu.memory_space<vmem>>, vector<16x128xf32>,
    return
  }
}

</mosaic_0001>

<bundles_post_ra>
// kernel: tile.9
= control target key start
LH: loop header
LB: loop body
LE: loop exit
PB: predicated region body
PF: predicated region fallthrough
CT: control target
= control target key end

     0   :  { %s32_s0 = inlined_call_operand.vmem [shape: f32[2,5,128], index: 0, kind: input, shape index: {}]   ;;  %s33_s1 = inlined_call_operand.vmem [shape: f32[10,128], index: 1, kind: output, shape index: {}]  }
   0x1   :  { %v2_v0 = vld [vmem:[%s32_s0] sm:$0x1f]   ;;  %v8_v1 = vld [vmem:[%s32_s0 + $0x8] sm:$0x1f]  }
   0x2   :  { %3 = vst [vmem:[%s33_s1] sm:$0x1f] %v2_v0   ;;  %9 = vst [vmem:[%s33_s1 + $0x5] sm:$0x1f] %v8_v1  }

// kernel: transformer_forward.1
= control target key start
LH: loop header
LB: loop body
LE: loop exit
PB: predicated region body
PF: predicated region fallthrough
CT: control target
= control target key end

     0   :  { %11 = vsyncpa [#allocation3], 0  ;;  %s4569_s21 = smov [#allocation2]   ;;  %s5318_s0 = inlined_call_operand.vmem [shape: f32[16,192], index: 0, kind: input, shape index: {}]   ;;  %s5319_s1 = inlined_call_operand.hbm [shape: f32[192,128], index: 1, kind: input, shape index: {}]   ;;  %s5320_s2 = inlined_call_operand.vmem [shape: f32[16,128], index: 2, kind: input, shape index: {}]   ;;  %s5321_s3 = inlined_call_operand.vmem [shape: f32[16,16], index: 3, kind: input, shape index: {}]   ;;  %s5322_s4 = inlined_call_operand.vmem [shape: f32[2,4,128,128], index: 4, kind: input, shape index: {}]   ;;  %s5323_s5 = inlined_call_operand.vmem [shape: f32[2,8,128], index: 5, kind: input, shape index: {}]   ;;  %s5324_s6 = inlined_call_operand.vmem [shape: f32[16,128], index: 6, kind: output, shape index: {}]  }
   0x1   :  { %s19_s22 = sshll.u32 %s4569_s21, 4  ;;  %s4545_s25 = scalar_lea.hbm %s5319_s1, 3072  ;;  %s20_s22 = int_to_ptr.vmem [resolvable:$true] %s19_s22 }
   0x2   :  { %p4546_p0 = scmp.ne.s32.totalorder %s5319_s1, %s4545_s25  ;;  %p4549_p1 = scmp.lt.u32.totalorder %s4545_s25, %s5319_s1 }
   0x4   :  { %p4551_p2 = pnand %p4549_p1, %p4546_p0 }
   0x6   :  { %4554 = shalt.err (!%p4551_p2)
}
   0x7   :  { %s4555_s30 = scalar_lea.vmem %s20_s22, 3072  ;;  %p4560_p4 = scmp.lt.s32.totalorder %s20_s22, %s20_s22 }
   0x8   :  { %p4556_p3 = scmp.ne.s32.totalorder %s20_s22, %s4555_s30  ;;  %p4561_p5 = scmp.lt.s32.totalorder %s4555_s30, %s4555_s30 }
   0xa   :  { %p4562_p6 = por %p4561_p5, %p4560_p4 }
   0xc   :  { %p4563_p7 = pnand %p4562_p6, %p4556_p3 }
   0xe   :  { %4566 = shalt.err (!%p4563_p7)
}
   0xf   :  { %s4570_s7 = smov 128   ;;  %s4571_s8 = smov 8  }
  0x10   :  { %25 = dma.hbm_to_vmem [thread:$0]  %s5319_s1, 3072, %s20_s22, [#allocation3], %s4570_s7, %s4570_s7, %s4571_s8  }
  0x11   :  { %4567 = dma.done.wait [#allocation3], 3072  }
  0x12   :  { %4568 = vsyncadd [#allocation3], 4294964224  ;;  %v4572_v0 = vmov 0.0|0.0   ;;  %v46_v1 = vld [vmem:[#allocation2] sm:$0xff]  ;;  %v47_v2 = vld [vmem:[#allocation2 + $0x8] sm:$0xff]  ;;  %vm72_vm0 = vcmask 523264   ;;  %v37_v55 = vlaneseq }
  0x13   :  { %4027 = vmatprep.subr.bf16.mxu0 %v4572_v0  ;;  %v48_v3 = vld [vmem:[#allocation2 + $0x10] sm:$0xff]  ;;  %v4028_v4 = vpack.c.bf16 %v47_v2, %v46_v1  ;;  %v49_v5 = vld [vmem:[#allocation2 + $0x18] sm:$0xff]  ;;  %v50_v7 = vld [vmem:[#allocation2 + $0x20] sm:$0xff]  ;;  %v4573_v59 = vmov 0.0   ;;  %vm339_vm2 = vcmask 64512   ;;  %s4574_s27 = smov 88  }
  0x14   :  { %v4031_v6 = vpack.c.bf16 %v49_v5, %v48_v3  ;;  %v51_v8 = vld [vmem:[#allocation2 + $0x28] sm:$0xff]  ;;  %v52_v10 = vld [vmem:[#allocation2 + $0x30] sm:$0xff]  ;;  %v53_v11 = vld [vmem:[#allocation2 + $0x38] sm:$0xff]  ;;  %v38_v56 = vand.u32 127, %v37_v55  ;;  %s4575_s28 = smov 96   ;;  %s4576_s29 = smov 120  }
  0x15   :  { %4029 = vmatpush1.bf16.msra.mxu0 %v4028_v4  ;;  %v4034_v9 = vpack.c.bf16 %v51_v8, %v50_v7  ;;  %v43_v12 = vld [vmem:[%s5318_s0 + $0x8] sm:$0xff]  ;;  %v4037_v13 = vpack.c.bf16 %v53_v11, %v52_v10  ;;  %v54_v14 = vld [vmem:[#allocation2 + $0x40] sm:$0xff]  ;;  %v56_v17 = vld [vmem:[#allocation2 + $0x50] sm:$0xff]  ;;  %vm427_vm4 = vcmask 130048   ;;  %s4577_s10 = smov 80   ;;  %s4578_s1 = smov 112  }
  0x16   :  { %4030 = vmatprep.subr.bf16.mxu0 %v4572_v0  ;;  %3314 = vmatprep.mubr.msk.f32.mxu0 %vm72_vm0, %v43_v12  ;;  %v55_v15 = vld [vmem:[#allocation2 + $0x48] sm:$0xff]  ;;  %v57_v18 = vld [vmem:[#allocation2 + $0x58] sm:$0xff]  ;;  %v58_v20 = vld [vmem:[#allocation2 + $0x60] sm:$0xff]  ;;  %vm39_vm1 = vcmp.lt.s32.totalorder %v38_v56, 32  ;;  %s4579_s11 = smov 72   ;;  %s4580_s12 = smov 104  }
  0x17   :  { %v4040_v16 = vpack.c.bf16 %v55_v15, %v54_v14  ;;  %v4043_v19 = vpack.c.bf16 %v57_v18, %v56_v17  ;;  %v59_v21 = vld [vmem:[#allocation2 + $0x68] sm:$0xff]  ;;  %v60_v23 = vld [vmem:[#allocation2 + $0x70] sm:$0xff]  ;;  %v61_v24 = vld [vmem:[#allocation2 + $0x78] sm:$0xff]  ;;  %v4670_v60 = vsel %vm39_vm1, 1.0, %v4573_v59  ;;  %s4581_s13 = smov 64   ;;  %s4582_s16 = smov 56  }
  0x18   :  { %v4046_v22 = vpack.c.bf16 %v59_v21, %v58_v20  ;;  %v4049_v25 = vpack.c.bf16 %v61_v24, %v60_v23  ;;  %v62_v26 = vld [vmem:[#allocation2 + $0x80] sm:$0xff]  ;;  %v63_v27 = vld [vmem:[#allocation2 + $0x88] sm:$0xff]  ;;  %v64_v29 = vld [vmem:[#allocation2 + $0x90] sm:$0xff]  ;;  %s4583_s19 = smov 48   ;;  %s4584_s20 = smov 40  }
  0x19   :  { %4032 = vmatpush1.bf16.msra.mxu0 %v4031_v6  ;;  %v4052_v28 = vpack.c.bf16 %v63_v27, %v62_v26  ;;  %v65_v30 = vld [vmem:[#allocation2 + $0x98] sm:$0xff]  ;;  %v66_v32 = vld [vmem:[#allocation2 + $0xa0] sm:$0xff]  ;;  %v67_v33 = vld [vmem:[#allocation2 + $0xa8] sm:$0xff] }
  0x1a   :  { %4033 = vmatprep.subr.bf16.mxu0 %v4572_v0  ;;  %v4055_v31 = vpack.c.bf16 %v65_v30, %v64_v29  ;;  %v4058_v34 = vpack.c.bf16 %v67_v33, %v66_v32  ;;  %v68_v35 = vld [vmem:[#allocation2 + $0xb0] sm:$0xff]  ;;  %v69_v36 = vld [vmem:[#allocation2 + $0xb8] sm:$0xff]  ;;  %v42_v38 = vld [vmem:[%s5318_s0] sm:$0xff]  ;;  %v4712_v29 = vshrl.u32 %v37_v55, 7 }
  0x1b   :  { %v4061_v37 = vpack.c.bf16 %v69_v36, %v68_v35  ;;  %v45_v39 = vld [vmem:[%s5318_s0 + $0x18] sm:$0xff]  ;;  %v44_v40 = vld [vmem:[%s5318_s0 + $0x10] sm:$0xff]  ;;  %v70_v41 = vld [vmem:[%s5320_s2] sm:$0xff] }
  0x1c   :  { %v71_v45 = vld [vmem:[%s5320_s2 + $0x8] sm:$0xff]  ;;  %v157_v49 = vld [vmem:[%s5322_s4] sm:$0xff]  ;;  %v159_v51 = vld [vmem:[%s5322_s4 + $0x10] sm:$0xff]  ;;  %v238_v30 = vsub.s32 0, %v4712_v29 }
  0x1d   :  { %4035 = vmatpush1.bf16.msra.mxu0 %v4034_v9  ;;  %v158_v50 = vld [vmem:[%s5322_s4 + $0x8] sm:$0xff]  ;;  %v160_v53 = vld [vmem:[%s5322_s4 + $0x18] sm:$0xff]  ;;  %v161_v5 = vld [vmem:[%s5322_s4 + $0x20] sm:$0xff] }
  0x1e   :  { %4036 = vmatprep.subr.bf16.mxu0 %v4572_v0  ;;  %v4063_v52 = vpack.c.bf16 %v158_v50, %v157_v49  ;;  %v4067_v54 = vpack.c.bf16 %v160_v53, %v159_v51  ;;  %v162_v6 = vld [vmem:[%s5322_s4 + $0x28] sm:$0xff]  ;;  %v163_v8 = vld [vmem:[%s5322_s4 + $0x30] sm:$0xff]  ;;  %v164_v9 = vld [vmem:[%s5322_s4 + $0x38] sm:$0xff] }
  0x1f   :  { %v4071_v7 = vpack.c.bf16 %v162_v6, %v161_v5  ;;  %v4075_v10 = vpack.c.bf16 %v164_v9, %v163_v8  ;;  %v165_v11 = vld [vmem:[%s5322_s4 + $0x40] sm:$0xff]  ;;  %v166_v12 = vld [vmem:[%s5322_s4 + $0x48] sm:$0xff]  ;;  %v167_v14 = vld [vmem:[%s5322_s4 + $0x50] sm:$0xff] }
  0x20   :  { %4064 = vmatprep.subr.bf16.mxu1 %v4063_v52  ;;  %v168_v15 = vld [vmem:[%s5322_s4 + $0x58] sm:$0xff]  ;;  %v170_v18 = vld [vmem:[%s5322_s4 + $0x68] sm:$0xff]  ;;  %v171_v20 = vld [vmem:[%s5322_s4 + $0x70] sm:$0xff] }
  0x21   :  { %4038 = vmatpush1.bf16.msra.mxu0 %v4037_v13  ;;  %4066 = vmatpush3.bf16.msra.mxu1 %v4063_v52  ;;  %v4079_v13 = vpack.c.bf16 %v166_v12, %v165_v11  ;;  %v4083_v17 = vpack.c.bf16 %v168_v15, %v167_v14  ;;  %v172_v21 = vld [vmem:[%s5322_s4 + $0x78] sm:$0xff]  ;;  %v4719_v32 = vld [vmem:[%s5323_s5] sm:$0xff]  ;;  %vm4742_vm3 = vmpackc.low %vm339_vm2, %vm339_vm2 }
  0x22   :  { %4039 = vmatprep.subr.bf16.mxu0 %v4572_v0  ;;  %4068 = vmatprep.subr.bf16.mxu1 %v4067_v54  ;;  %v239_v33 = vrot.slane %v4719_v32, %v238_v30  ;;  %v4765_v5 = vld [vmem:[%s5321_s3] sm:$0xff] }
  0x25   :  { %4041 = vmatpush1.bf16.msra.mxu0 %v4040_v16  ;;  %4070 = vmatpush3.bf16.msra.mxu1 %v4067_v54  ;;  %v169_v16 = vld [vmem:[%s5322_s4 + $0x60] sm:$0xff] }
  0x26   :  { %4042 = vmatprep.subr.bf16.mxu0 %v4572_v0  ;;  %4072 = vmatprep.subr.bf16.mxu1 %v4071_v7 }
  0x29   :  { %4044 = vmatpush1.bf16.msra.mxu0 %v4043_v19  ;;  %4074 = vmatpush3.bf16.msra.mxu1 %v4071_v7  ;;  %v4087_v19 = vpack.c.bf16 %v170_v18, %v169_v16 }
  0x2a   :  { %4045 = vmatprep.subr.bf16.mxu0 %v4572_v0  ;;  %4076 = vmatprep.subr.bf16.mxu1 %v4075_v10 }
  0x2d   :  { %4047 = vmatpush1.bf16.msra.mxu0 %v4046_v22  ;;  %4078 = vmatpush3.bf16.msra.mxu1 %v4075_v10  ;;  %v4091_v22 = vpack.c.bf16 %v172_v21, %v171_v20 }
  0x2e   :  { %4048 = vmatprep.subr.bf16.mxu0 %v4572_v0  ;;  %4080 = vmatprep.subr.bf16.mxu1 %v4079_v13 }
  0x31   :  { %4050 = vmatpush1.bf16.msra.mxu0 %v4049_v25  ;;  %4082 = vmatpush3.bf16.msra.mxu1 %v4079_v13 }
  0x32   :  { %4051 = vmatprep.subr.bf16.mxu0 %v4572_v0  ;;  %4084 = vmatprep.subr.bf16.mxu1 %v4083_v17 }
  0x35   :  { %4053 = vmatpush1.bf16.msra.mxu0 %v4052_v28  ;;  %4086 = vmatpush3.bf16.msra.mxu1 %v4083_v17 }
  0x36   :  { %4054 = vmatprep.subr.bf16.mxu0 %v4572_v0  ;;  %4088 = vmatprep.subr.bf16.mxu1 %v4087_v19 }
  0x39   :  { %4056 = vmatpush1.bf16.msra.mxu0 %v4055_v31  ;;  %4090 = vmatpush3.bf16.msra.mxu1 %v4087_v19  ;;  %v244_v31 = vsub.s32 1, %v4712_v29 }
  0x3a   :  { %4057 = vmatprep.subr.bf16.mxu0 %v4572_v0  ;;  %4092 = vmatprep.subr.bf16.mxu1 %v4091_v22 }
  0x3b   :  { %v245_v36 = vrot.slane %v4719_v32, %v244_v31 }
  0x3d   :  { %4059 = vmatpush1.bf16.msra.mxu0 %v4058_v34  ;;  %4094 = vmatpush3.bf16.msra.mxu1 %v4091_v22 }
  0x3e   :  { %4060 = vmatprep.subr.bf16.mxu0 %v4572_v0 }
  0x41   :  { %4062 = vmatpush1.bf16.msra.mxu0 %v4061_v37 }
  0x44   :  { %144 = vmatmul.mubr.f32.vlgmr.msra.gmra.mrb[0].mxu0 %v42_v38 }
  0x45   :  { %3315 = vmatprep.mubr.msk.f32.mxu0 %vm72_vm0, %v45_v39 }
  0x48   :  { %149 = vmatmul.mubr.f32.gmra.mrb[2].mxu0 %v44_v40 }
 0x117   :  { %v145_v42 = vpop.f32.mrb[0].mxu0 }
 0x118   :  { %v4649_v43 = vadd.f32 %v145_v42, %v70_v41  ;;  %v147_v44 = vpop.f32.mrb[1].mxu0 }
 0x119   :  { %v250_v44 = vsub.s32 2, %v4712_v29 }
 0x11a   :  { %212 = vadd.xlane.f32.xlu0 %v4649_v43 }
 0x11b   :  { %v150_v46 = vpop.f32.mrb[2].mxu0 }
 0x11c   :  { %v4655_v47 = vadd.f32 %v150_v46, %v71_v45  ;;  %v152_v48 = vpop.f32.mrb[3].mxu0  ;;  %v251_v45 = vrot.slane %v4719_v32, %v250_v44 }
 0x11e   :  { %214 = vadd.xlane.f32.xlu0 %v4655_v47 }
 0x1a7   :  { %v213_v57 = vpop.xlane.xlu0 %212 }
 0x1a8   :  { %v216_v58 = vmul.f32 0.03125, %v213_v57 }
 0x1aa   :  { %v218_v61 = vsub.f32 %v4649_v43, %v216_v58 }
 0x1ab   :  { %v215_v62 = vpop.xlane.xlu0 %214 }
 0x1ac   :  { %v217_v63 = vmul.f32 0.03125, %v215_v62  ;;  %v220_v0 = vmul.f32 %v4670_v60, %v218_v61 }
 0x1ae   :  { %v219_v1 = vsub.f32 %v4655_v47, %v217_v63  ;;  %v222_v2 = vmul.f32 %v220_v0, %v220_v0 }
 0x1b0   :  { %224 = vadd.xlane.f32.xlu1 %v222_v2  ;;  %v221_v3 = vmul.f32 %v4670_v60, %v219_v1  ;;  %v4760_v1 = vld [vmem:[%s5321_s3 + $0x8] sm:$0xff] }
 0x1b2   :  { %v223_v4 = vmul.f32 %v221_v3, %v221_v3 }
 0x1b4   :  { %226 = vadd.xlane.f32.xlu1 %v223_v4 }
 0x23d   :  { %v225_v23 = vpop.xlane.xlu1 %224 }
 0x23e   :  { %v228_v24 = vmul.f32 0.03125, %v225_v23 }
 0x240   :  { %v230_v25 = vadd.f32 1e-06, %v228_v24 }
 0x241   :  { %v227_v26 = vpop.xlane.xlu1 %226 }
 0x242   :  { %4447 = vrsqrt.f32 %v230_v25  ;;  %v229_v27 = vmul.f32 0.03125, %v227_v26 }
 0x244   :  { %v231_v28 = vadd.f32 1e-06, %v229_v27 }
 0x246   :  { %4449 = vrsqrt.f32 %v231_v28 }
 0x24c   :  { %v4448_v34 = vpop.eup %4447 }
 0x24d   :  { %v234_v35 = vmul.f32 %v4448_v34, %v220_v0 }
 0x24f   :  { %v240_v37 = vmul.f32 %v239_v33, %v234_v35 }
 0x250   :  { %v4450_v38 = vpop.eup %4449 }
 0x251   :  { %v246_v39 = vadd.f32 %v245_v36, %v240_v37  ;;  %v235_v40 = vmul.f32 %v4450_v38, %v221_v3 }
 0x253   :  { %3697 = vmatprep.mubr.f32.mxu1 %v246_v39  ;;  %v241_v41 = vmul.f32 %v239_v33, %v235_v40 }
 0x255   :  { %v247_v42 = vadd.f32 %v245_v36, %v241_v41 }
 0x257   :  { %3698 = vmatmul.mubr.f32.vlgmr.msra.gmra.mrb[0].mxu1 %v247_v42 }
 0x32a   :  { %v3699_v46 = vpop.f32.mrb[0].mxu1 }
 0x32b   :  { %v324_v48 = vadd.f32 %v3699_v46, %v251_v45  ;;  %v318_v49 = vpop.f32.mrb[1].mxu1 }
 0x32c   :  { %v319_v50 = vadd.f32 %v318_v49, %v251_v45 }
 0x32e   :  { %3704 = vmatprep.mubr.msk.f32.mxu1 %vm339_vm2, %v319_v50  ;;  %v4732_v51 = vpack.i.bf16 %v324_v48, %v319_v50 }
 0x330   :  { %4373 = vrot.lane.b32.xlu1 %v4732_v51, %s4574_s27  ;;  %4368 = vrot.lane.b32.xlu0 %v4732_v51, %s4575_s28 }
 0x334   :  { %620 = vrot.lane.b32.xlu1 %v319_v50, %s4576_s29 }
 0x338   :  { %622 = vrot.lane.b32.xlu1 %v324_v48, %s4576_s29 }
 0x3a2   :  { %v4374_v52 = vpop.permute.xlu1 %4373  ;;  %v4369_v53 = vpop.permute.xlu0 %4368 }
 0x3a3   :  { %v4376_v54 = vunpack.i.h.bf16 %v4374_v52  ;;  %v4375_v55 = vunpack.i.l.bf16 %v4374_v52  ;;  %v4371_v56 = vunpack.i.h.bf16 %v4369_v53  ;;  %v4370_v57 = vunpack.i.l.bf16 %v4369_v53 }
 0x3a5   :  { %v4105_v59 = vpack.c.bf16 %v4376_v54, %v4375_v55  ;;  %v4095_v61 = vpack.c.bf16 %v4371_v56, %v4370_v57 }
 0x3a6   :  { %v621_v62 = vpop.permute.xlu1 %620 }
 0x3a7   :  { %4097 = vmatprep.subr.msk.bf16.mxu1 %vm4742_vm3, %v4095_v61  ;;  %4107 = vmatprep.subr.msk.bf16.mxu0 %vm4742_vm3, %v4105_v59 }
 0x3a8   :  { %3723 = vmatprep.mubr.msk.f32.mxu0 %vm339_vm2, %v621_v62  ;;  %4100 = vmatpush3.bf16.xpose.msk.msra.mxu1 %vm4742_vm3, %v4095_v61 }
 0x3a9   :  { %4110 = vmatpush3.bf16.xpose.msk.msra.mxu0 %vm4742_vm3, %v4105_v59 }
 0x3aa   :  { %v623_v63 = vpop.permute.xlu1 %622 }
 0x3af   :  { %3705 = vmatmul.mubr.msk.f32.vlgmr.msra.gmra.mrb[2].mxu1 %vm339_vm2, %v324_v48 }
 0x3b0   :  { %3724 = vmatmul.mubr.msk.f32.vlgmr.msra.gmra.mrb[4].mxu0 %vm339_vm2, %v623_v63 }
 0x482   :  { %v3706_v0 = vpop.f32.mrb[2].mxu1 }
 0x483   :  { %v424_v2 = vmul.f32 0.35355338, %v3706_v0  ;;  %v3725_v3 = vpop.f32.mrb[4].mxu0  ;;  %v414_v4 = vpop.f32.mrb[3].mxu1 }
 0x484   :  { %v423_v6 = vmul.f32 0.35355338, %v414_v4  ;;  %v702_v7 = vpop.f32.mrb[5].mxu0  ;;  %v712_v12 = vmul.f32 0.35355338, %v3725_v3 }
 0x485   :  { %v426_v8 = vadd.f32 %v424_v2, %v4760_v1  ;;  %v711_v38 = vmul.f32 0.35355338, %v702_v7 }
 0x486   :  { %v425_v9 = vadd.f32 %v423_v6, %v4765_v5  ;;  %v714_v13 = vadd.f32 %v712_v12, %v4760_v1 }
 0x487   :  { %v431_v10 = vsel %vm427_vm4, %v426_v8, -inf  ;;  %v713_v46 = vadd.f32 %v711_v38, %v4765_v5 }
 0x488   :  { %432 = vmax.xlane.f32.xlu1 %v431_v10  ;;  %v428_v11 = vsel %vm427_vm4, %v425_v9, -inf  ;;  %v718_v14 = vsel %vm427_vm4, %v714_v13, -inf }
 0x489   :  { %429 = vmax.xlane.f32.xlu0 %v428_v11 }
 0x499   :  { %4383 = vrot.lane.b32.xlu1 %v4732_v51, %s4577_s10 }
 0x49d   :  { %907 = vrot.lane.b32.xlu1 %v319_v50, %s4578_s1 }
 0x4a1   :  { %909 = vrot.lane.b32.xlu1 %v324_v48, %s4578_s1 }
 0x4c5   :  { %719 = vmax.xlane.f32.xlu1 %v718_v14 }
 0x4d6   :  { %4393 = vrot.lane.b32.xlu1 %v4732_v51, %s4579_s11 }
 0x4da   :  { %1194 = vrot.lane.b32.xlu1 %v319_v50, %s4580_s12 }
 0x4de   :  { %1196 = vrot.lane.b32.xlu1 %v324_v48, %s4580_s12  ;;  %v715_v48 = vsel %vm427_vm4, %v713_v46, -inf }
 0x515   :  { %v433_v15 = vpop.xlane.xlu1 %432 }
 0x516   :  { %v435_v16 = vsub.f32 %v426_v8, %v433_v15  ;;  %v430_v17 = vpop.xlane.xlu0 %429 }
 0x517   :  { %v434_v18 = vsub.f32 %v425_v9, %v430_v17 }
 0x518   :  { %v438_v19 = vmul.f32 1.442695, %v435_v16 }
 0x519   :  { %v436_v20 = vmul.f32 1.442695, %v434_v18  ;;  %v4384_v21 = vpop.permute.xlu1 %4383 }
 0x51a   :  { %4451 = vpow2.f32 %v438_v19  ;;  %v4386_v22 = vunpack.i.h.bf16 %v4384_v21  ;;  %v4385_v23 = vunpack.i.l.bf16 %v4384_v21 }
 0x51b   :  { %4453 = vpow2.f32 %v436_v20 }
 0x51c   :  { %v4115_v24 = vpack.c.bf16 %v4386_v22, %v4385_v23 }
 0x51d   :  { %v908_v25 = vpop.permute.xlu1 %907 }
 0x51e   :  { %4117 = vmatprep.subr.msk.bf16.mxu0 %vm4742_vm3, %v4115_v24  ;;  %3742 = vmatprep.mubr.msk.f32.mxu0 %vm339_vm2, %v908_v25 }
 0x51f   :  { %4120 = vmatpush3.bf16.xpose.msk.msra.mxu0 %vm4742_vm3, %v4115_v24 }
 0x521   :  { %v910_v27 = vpop.permute.xlu1 %909 }
 0x524   :  { %v4452_v26 = vpop.eup %4451 }
 0x525   :  { %v443_v28 = vsel %vm427_vm4, %v4452_v26, 0.0  ;;  %v4454_v33 = vpop.eup %4453 }
 0x526   :  { %3743 = vmatmul.mubr.msk.f32.vlgmr.msra.gmra.mrb[6].mxu0 %vm339_vm2, %v910_v27  ;;  %444 = vadd.xlane.f32.xlu0 %v443_v28  ;;  %v440_v34 = vsel %vm427_vm4, %v4454_v33, 0.0 }
 0x52a   :  { %441 = vadd.xlane.f32.xlu0 %v440_v34 }
 0x540   :  { %4378 = vrot.lane.b32.xlu0 %v4732_v51, %s4581_s13 }
 0x552   :  { %v720_v35 = vpop.xlane.xlu1 %719 }
 0x553   :  { %v722_v36 = vsub.f32 %v714_v13, %v720_v35  ;;  %v3316_v13 = vld [vmem:[%s5322_s4 + $0x80] sm:$0xff] }
 0x555   :  { %v725_v37 = vmul.f32 1.442695, %v722_v36 }
 0x556   :  { %v4394_v39 = vpop.permute.xlu1 %4393 }
 0x557   :  { %4455 = vpow2.f32 %v725_v37  ;;  %v4396_v40 = vunpack.i.h.bf16 %v4394_v39  ;;  %v4395_v41 = vunpack.i.l.bf16 %v4394_v39 }
 0x559   :  { %v4125_v42 = vpack.c.bf16 %v4396_v40, %v4395_v41 }
 0x55a   :  { %v1195_v45 = vpop.permute.xlu1 %1194 }
 0x55b   :  { %4127 = vmatprep.subr.msk.bf16.mxu0 %vm4742_vm3, %v4125_v42  ;;  %3761 = vmatprep.mubr.msk.f32.mxu0 %vm339_vm2, %v1195_v45 }
 0x55c   :  { %4130 = vmatpush3.bf16.xpose.msk.msra.mxu0 %vm4742_vm3, %v4125_v42 }
 0x55e   :  { %v1197_v50 = vpop.permute.xlu1 %1196 }
 0x55f   :  { %716 = vmax.xlane.f32.xlu0 %v715_v48 }
 0x561   :  { %v4798_v49 = vpop.eup %4455 }
 0x562   :  { %v730_v52 = vsel %vm427_vm4, %v4798_v49, 0.0 }
 0x563   :  { %3762 = vmatmul.mubr.msk.f32.vlgmr.msra.gmra.mrb[8].mxu0 %vm339_vm2, %v1197_v50  ;;  %731 = vadd.xlane.f32.xlu0 %v730_v52 }
 0x5b3   :  { %v445_v53 = vpop.xlane.xlu0 %444 }
 0x5b4   :  { %4457 = vrcp.f32 %v445_v53 }
 0x5b7   :  { %v442_v54 = vpop.xlane.xlu0 %441 }
 0x5b8   :  { %4459 = vrcp.f32 %v442_v54 }
 0x5bb   :  { %v4379_v55 = vpop.permute.xlu0 %4378 }
 0x5bc   :  { %v4381_v56 = vunpack.i.h.bf16 %v4379_v55  ;;  %v4380_v57 = vunpack.i.l.bf16 %v4379_v55 }
 0x5be   :  { %v4101_v59 = vpack.c.bf16 %v4381_v56, %v4380_v57  ;;  %v4458_v61 = vpop.eup %4457 }
 0x5bf   :  { %v449_v0 = vmul.f32 %v4458_v61, %v4452_v26 }
 0x5c0   :  { %4102 = vmatprep.subr.bf16.mxu1 %v4101_v59 }
 0x5c1   :  { %4104 = vmatpush3.bf16.msra.mxu1 %v4101_v59 }
 0x5c2   :  { %v4460_v62 = vpop.eup %4459  ;;  %3714 = vmatprep.subr.mxu1 %v3316_v13 }
 0x5c3   :  { %v447_v63 = vmul.f32 %v4460_v62, %v4454_v33 }
 0x5c5   :  { %3711 = vmatprep.mubr.msk.f32.mxu1 %vm427_vm4, %v447_v63 }
 0x5c6   :  { %3712 = vmatmul.mubr.msk.f32.vlgmr.msra.gmra.mrb[4].mxu1 %vm427_vm4, %v449_v0 }
 0x5c7   :  { %3715 = vmatpush3.msra.mxu1 %v3316_v13 }
 0x5ec   :  { %v717_v2 = vpop.xlane.xlu0 %716 }
 0x5ed   :  { %v721_v3 = vsub.f32 %v713_v46, %v717_v2  ;;  %v3317_v2 = vld [vmem:[%s5322_s4 + $0x88] sm:$0xff] }
 0x5ef   :  { %v723_v4 = vmul.f32 1.442695, %v721_v3 }
 0x5f0   :  { %v732_v25 = vpop.xlane.xlu0 %731 }
 0x5f1   :  { %4461 = vpow2.f32 %v723_v4 }
 0x5f9   :  { %v3744_v6 = vpop.f32.mrb[6].mxu0 }
 0x5fa   :  { %v999_v7 = vmul.f32 0.35355338, %v3744_v6  ;;  %v989_v8 = vpop.f32.mrb[7].mxu0 }
 0x5fb   :  { %v4462_v9 = vpop.eup %4461  ;;  %v998_v14 = vmul.f32 0.35355338, %v989_v8 }
 0x5fc   :  { %v727_v10 = vsel %vm427_vm4, %v4462_v9, 0.0  ;;  %v1001_v11 = vadd.f32 %v999_v7, %v4760_v1 }
 0x5fd   :  { %728 = vadd.xlane.f32.xlu0 %v727_v10  ;;  %v1000_v15 = vadd.f32 %v998_v14, %v4765_v5 }
 0x5fe   :  { %v1005_v12 = vsel %vm427_vm4, %v1001_v11, -inf }
 0x5ff   :  { %1006 = vmax.xlane.f32.xlu1 %v1005_v12  ;;  %v1002_v16 = vsel %vm427_vm4, %v1000_v15, -inf }
 0x613   :  { %4388 = vrot.lane.b32.xlu0 %v4732_v51, %s4582_s16 }
 0x632   :  { %1003 = vmax.xlane.f32.xlu0 %v1002_v16 }
 0x636   :  { %v3763_v17 = vpop.f32.mrb[8].mxu0 }
 0x637   :  { %v1276_v18 = vpop.f32.mrb[9].mxu0  ;;  %v1286_v19 = vmul.f32 0.35355338, %v3763_v17 }
 0x638   :  { %v1285_v20 = vmul.f32 0.35355338, %v1276_v18 }
 0x639   :  { %v1288_v23 = vadd.f32 %v1286_v19, %v4760_v1 }
 0x63a   :  { %v1287_v21 = vadd.f32 %v1285_v20, %v4765_v5 }
 0x63b   :  { %v1292_v24 = vsel %vm427_vm4, %v1288_v23, -inf }
 0x63c   :  { %v1289_v22 = vsel %vm427_vm4, %v1287_v21, -inf }
 0x63d   :  { %1290 = vmax.xlane.f32.xlu1 %v1289_v22 }
 0x641   :  { %1293 = vmax.xlane.f32.xlu1 %v1292_v24 }
 0x68a   :  { %v729_v26 = vpop.xlane.xlu0 %728 }
 0x68b   :  { %4463 = vrcp.f32 %v729_v26 }
 0x68c   :  { %v1007_v27 = vpop.xlane.xlu1 %1006  ;;  %4465 = vrcp.f32 %v732_v25 }
 0x68d   :  { %v1009_v28 = vsub.f32 %v1001_v11, %v1007_v27  ;;  %v3319_v27 = vld [vmem:[%s5322_s4 + $0x98] sm:$0xff] }
 0x68e   :  { %v4389_v33 = vpop.permute.xlu0 %4388 }
 0x68f   :  { %v1012_v34 = vmul.f32 1.442695, %v1009_v28  ;;  %v4391_v35 = vunpack.i.h.bf16 %v4389_v33  ;;  %v4390_v36 = vunpack.i.l.bf16 %v4389_v33 }
 0x691   :  { %4467 = vpow2.f32 %v1012_v34  ;;  %v4111_v5 = vpack.c.bf16 %v4391_v35, %v4390_v36  ;;  %v329_v35 = vsub.s32 3, %v4712_v29 }
 0x693   :  { %4112 = vmatprep.subr.bf16.mxu1 %v4111_v5  ;;  %v330_v36 = vrot.slane %v4719_v32, %v329_v35 }
 0x695   :  { %v4464_v37 = vpop.eup %4463 }
 0x696   :  { %v4466_v1 = vpop.eup %4465  ;;  %v734_v42 = vmul.f32 %v4464_v37, %v4462_v9 }
 0x697   :  { %v736_v45 = vmul.f32 %v4466_v1, %v4798_v49 }
 0x699   :  { %v3713_v38 = vpop.f32.mrb[4].mxu1 }
 0x69a   :  { %v528_v39 = vpop.f32.mrb[5].mxu1 }
 0x69b   :  { %v4468_v40 = vpop.eup %4467  ;;  %3716 = vmatprep.mubr.msk.f32.mxu1 %vm339_vm2, %v528_v39 }
 0x69c   :  { %3717 = vmatmul.mubr.msk.f32.vlgmr.msra.gmra.mrb[6].mxu1 %vm339_vm2, %v3713_v38  ;;  %v1017_v41 = vsel %vm427_vm4, %v4468_v40, 0.0  ;;  %v331_v38 = vadd.f32 %v330_v36, %v4649_v43  ;;  %v3322_v43 = vld [vmem:[%s5322_s4 + $0x110] sm:$0xff] }
 0x69d   :  { %4114 = vmatpush3.bf16.msra.mxu1 %v4111_v5  ;;  %1018 = vadd.xlane.f32.xlu0 %v1017_v41  ;;  %v332_v5 = vadd.f32 %v330_v36, %v4655_v47  ;;  %v3320_v41 = vld [vmem:[%s5322_s4 + $0x100] sm:$0xff]  ;;  %v3321_v47 = vld [vmem:[%s5322_s4 + $0x108] sm:$0xff] }
 0x69e   :  { %3730 = vmatprep.mubr.msk.f32.mxu1 %vm427_vm4, %v734_v42  ;;  %3733 = vmatprep.subr.mxu1 %v3317_v2  ;;  %v4135_v42 = vpack.c.bf16 %v3321_v47, %v3320_v41  ;;  %v3338_v47 = vld [vmem:[%s5322_s4 + $0x190] sm:$0xff] }
 0x6a0   :  { %3731 = vmatmul.mubr.msk.f32.vlgmr.msra.gmra.mrb[8].mxu1 %vm427_vm4, %v736_v45  ;;  %v3323_v45 = vld [vmem:[%s5322_s4 + $0x118] sm:$0xff]  ;;  %4136 = vmatprep.subr.bf16.mxu0 %v4135_v42 }
 0x6a1   :  { %3734 = vmatpush3.msra.mxu1 %v3317_v2  ;;  %4138 = vmatpush3.bf16.msra.mxu0 %v4135_v42  ;;  %v3327_v2 = vld [vmem:[%s5322_s4 + $0x138] sm:$0xff] }
 0x6bf   :  { %v1004_v46 = vpop.xlane.xlu0 %1003 }
 0x6c0   :  { %v1008_v48 = vsub.f32 %v1000_v15, %v1004_v46  ;;  %v4139_v46 = vpack.c.bf16 %v3323_v45, %v3322_v43  ;;  %v3339_v43 = vld [vmem:[%s5322_s4 + $0x198] sm:$0xff]  ;;  %v3340_v45 = vld [vmem:[%s5322_s4 + $0x1a0] sm:$0xff] }
 0x6c1   :  { %v4171_v42 = vpack.c.bf16 %v3339_v43, %v3338_v47 }
 0x6c2   :  { %v1010_v50 = vmul.f32 1.442695, %v1008_v48  ;;  %4140 = vmatprep.subr.bf16.mxu0 %v4139_v46 }
 0x6c3   :  { %4142 = vmatpush3.bf16.msra.mxu0 %v4139_v46  ;;  %v3341_v46 = vld [vmem:[%s5322_s4 + $0x1a8] sm:$0xff] }
 0x6c4   :  { %4469 = vpow2.f32 %v1010_v50 }
 0x6ca   :  { %v1291_v52 = vpop.xlane.xlu1 %1290 }
 0x6cb   :  { %v1295_v53 = vsub.f32 %v1287_v21, %v1291_v52 }
 0x6cd   :  { %v1297_v59 = vmul.f32 1.442695, %v1295_v53 }
 0x6ce   :  { %v4470_v54 = vpop.eup %4469  ;;  %v1294_v55 = vpop.xlane.xlu1 %1293 }
 0x6cf   :  { %v1296_v56 = vsub.f32 %v1288_v23, %v1294_v55  ;;  %v1014_v57 = vsel %vm427_vm4, %v4470_v54, 0.0 }
 0x6d0   :  { %1015 = vadd.xlane.f32.xlu0 %v1014_v57 }
 0x6d1   :  { %v1299_v61 = vmul.f32 1.442695, %v1296_v56 }
 0x6d3   :  { %4471 = vpow2.f32 %v1299_v61 }
 0x6d4   :  { %4473 = vpow2.f32 %v1297_v59 }
 0x6dd   :  { %v4472_v49 = vpop.eup %4471 }
 0x6de   :  { %v1304_v62 = vsel %vm427_vm4, %v4472_v49, 0.0  ;;  %v4474_v63 = vpop.eup %4473 }
 0x6df   :  { %1305 = vadd.xlane.f32.xlu1 %v1304_v62  ;;  %v1301_v0 = vsel %vm427_vm4, %v4474_v63, 0.0  ;;  %v3325_v62 = vld [vmem:[%s5322_s4 + $0x128] sm:$0xff] }
 0x6e3   :  { %1302 = vadd.xlane.f32.xlu1 %v1301_v0  ;;  %v3326_v0 = vld [vmem:[%s5322_s4 + $0x130] sm:$0xff] }
 0x6e6   :  { %4398 = vrot.lane.b32.xlu0 %v4732_v51, %s4583_s19 }
 0x6f4   :  { %4403 = vrot.lane.b32.xlu1 %v4732_v51, %s4584_s20  ;;  %v3318_v51 = vld [vmem:[%s5322_s4 + $0x90] sm:$0xff] }
 0x72a   :  { %v1019_v3 = vpop.xlane.xlu0 %1018 }
 0x75d   :  { %v1016_v4 = vpop.xlane.xlu0 %1015 }
 0x75e   :  { %4475 = vrcp.f32 %v1016_v4  ;;  %v3328_v4 = vld [vmem:[%s5322_s4 + $0x140] sm:$0xff] }
 0x75f   :  { %4477 = vrcp.f32 %v1019_v3  ;;  %v4147_v3 = vpack.c.bf16 %v3327_v2, %v3326_v0  ;;  %v3350_v0 = vld [vmem:[%s5322_s4 + $0x1f0] sm:$0xff]  ;;  %v3351_v2 = vld [vmem:[%s5322_s4 + $0x1f8] sm:$0xff] }
 0x761   :  { %v4399_v6 = vpop.permute.xlu0 %4398 }
 0x762   :  { %v4401_v7 = vunpack.i.h.bf16 %v4399_v6  ;;  %v4400_v8 = vunpack.i.l.bf16 %v4399_v6  ;;  %v3329_v6 = vld [vmem:[%s5322_s4 + $0x148] sm:$0xff] }
 0x764   :  { %v4121_v9 = vpack.c.bf16 %v4401_v7, %v4400_v8  ;;  %v4151_v7 = vpack.c.bf16 %v3329_v6, %v3328_v4  ;;  %v3330_v8 = vld [vmem:[%s5322_s4 + $0x150] sm:$0xff]  ;;  %v1519_v4 = vsub.s32 6, %v4712_v29 }
 0x766   :  { %4122 = vmatprep.subr.bf16.mxu1 %v4121_v9  ;;  %v1520_v6 = vrot.slane %v4719_v32, %v1519_v4 }
 0x768   :  { %v4476_v12 = vpop.eup %4475 }
 0x769   :  { %v4478_v16 = vpop.eup %4477  ;;  %v1021_v17 = vmul.f32 %v4476_v12, %v4470_v54  ;;  %v3333_v12 = vld [vmem:[%s5322_s4 + $0x168] sm:$0xff] }
 0x76a   :  { %v1023_v20 = vmul.f32 %v4478_v16, %v4468_v40 }
 0x76c   :  { %v1306_v10 = vpop.xlane.xlu1 %1305 }
 0x770   :  { %v1303_v11 = vpop.xlane.xlu1 %1302 }
 0x771   :  { %4479 = vrcp.f32 %v1303_v11  ;;  %v3332_v11 = vld [vmem:[%s5322_s4 + $0x160] sm:$0xff] }
 0x772   :  { %4481 = vrcp.f32 %v1306_v10 }
 0x773   :  { %v3732_v13 = vpop.f32.mrb[8].mxu1 }
 0x774   :  { %v4404_v14 = vpop.permute.xlu1 %4403  ;;  %v815_v15 = vpop.f32.mrb[9].mxu1 }
 0x775   :  { %3735 = vmatprep.mubr.msk.f32.mxu1 %vm339_vm2, %v815_v15  ;;  %v4406_v18 = vunpack.i.h.bf16 %v4404_v14  ;;  %v4405_v19 = vunpack.i.l.bf16 %v4404_v14  ;;  %v3334_v14 = vld [vmem:[%s5322_s4 + $0x170] sm:$0xff]  ;;  %v3335_v15 = vld [vmem:[%s5322_s4 + $0x178] sm:$0xff] }
 0x776   :  { %3736 = vmatmul.mubr.msk.f32.vlgmr.msra.gmra.mrb[6].mxu1 %vm339_vm2, %v3732_v13  ;;  %v4159_v13 = vpack.c.bf16 %v3333_v12, %v3332_v11  ;;  %v4163_v16 = vpack.c.bf16 %v3335_v15, %v3334_v14 }
 0x777   :  { %4124 = vmatpush3.bf16.msra.mxu1 %v4121_v9  ;;  %3749 = vmatprep.mubr.msk.f32.mxu1 %vm427_vm4, %v1021_v17  ;;  %v4131_v21 = vpack.c.bf16 %v4406_v18, %v4405_v19  ;;  %v3331_v9 = vld [vmem:[%s5322_s4 + $0x158] sm:$0xff] }
 0x778   :  { %3752 = vmatprep.subr.mxu1 %v3318_v51  ;;  %v4155_v10 = vpack.c.bf16 %v3331_v9, %v3330_v8 }
 0x77a   :  { %3750 = vmatmul.mubr.msk.f32.vlgmr.msra.gmra.mrb[10].mxu1 %vm427_vm4, %v1023_v20 }
 0x77b   :  { %3753 = vmatpush3.msra.mxu1 %v3318_v51  ;;  %v4480_v22 = vpop.eup %4479 }
 0x77c   :  { %4132 = vmatprep.subr.bf16.mxu1 %v4131_v21  ;;  %v4482_v25 = vpop.eup %4481  ;;  %v1308_v26 = vmul.f32 %v4480_v22, %v4474_v63  ;;  %v1507_v22 = vsub.s32 4, %v4712_v29 }
 0x77d   :  { %v1310_v28 = vmul.f32 %v4482_v25, %v4472_v49  ;;  %v3324_v49 = vld [vmem:[%s5322_s4 + $0x120] sm:$0xff] }
 0x77e   :  { %v4143_v63 = vpack.c.bf16 %v3325_v62, %v3324_v49  ;;  %v3348_v49 = vld [vmem:[%s5322_s4 + $0x1e0] sm:$0xff]  ;;  %v3349_v62 = vld [vmem:[%s5322_s4 + $0x1e8] sm:$0xff] }
 0x780   :  { %4144 = vmatprep.subr.bf16.mxu0 %v4143_v63 }
 0x781   :  { %4146 = vmatpush3.bf16.msra.mxu0 %v4143_v63  ;;  %v4191_v63 = vpack.c.bf16 %v3349_v62, %v3348_v49 }
 0x782   :  { %4148 = vmatprep.subr.bf16.mxu0 %v4147_v3 }
 0x785   :  { %4150 = vmatpush3.bf16.msra.mxu0 %v4147_v3  ;;  %v4195_v3 = vpack.c.bf16 %v3351_v2, %v3350_v0 }
 0x786   :  { %4152 = vmatprep.subr.bf16.mxu0 %v4151_v7 }
 0x789   :  { %4154 = vmatpush3.bf16.msra.mxu0 %v4151_v7 }
 0x78a   :  { %4156 = vmatprep.subr.bf16.mxu0 %v4155_v10 }
 0x78d   :  { %4158 = vmatpush3.bf16.msra.mxu0 %v4155_v10 }
 0x78e   :  { %4160 = vmatprep.subr.bf16.mxu0 %v4159_v13 }
 0x791   :  { %4162 = vmatpush3.bf16.msra.mxu0 %v4159_v13 }
 0x792   :  { %4164 = vmatprep.subr.bf16.mxu0 %v4163_v16 }
 0x795   :  { %4166 = vmatpush3.bf16.msra.mxu0 %v4163_v16 }
 0x84d   :  { %v3751_v23 = vpop.f32.mrb[10].mxu1 }
 0x84e   :  { %v1102_v24 = vpop.f32.mrb[11].mxu1 }
 0x84f   :  { %3754 = vmatprep.mubr.msk.f32.mxu1 %vm339_vm2, %v1102_v24  ;;  %v1508_v24 = vrot.slane %v4719_v32, %v1507_v22 }
 0x850   :  { %3755 = vmatmul.mubr.msk.f32.vlgmr.msra.gmra.mrb[6].mxu1 %vm339_vm2, %v3751_v23  ;;  %v1513_v23 = vsub.s32 5, %v4712_v29 }
 0x851   :  { %4134 = vmatpush3.bf16.msra.mxu1 %v4131_v21  ;;  %3768 = vmatprep.mubr.msk.f32.mxu1 %vm427_vm4, %v1308_v26 }
 0x852   :  { %3771 = vmatprep.subr.mxu1 %v3319_v27 }
 0x854   :  { %3769 = vmatmul.mubr.msk.f32.vlgmr.msra.gmra.mrb[12].mxu1 %vm427_vm4, %v1310_v28 }
 0x855   :  { %3772 = vmatpush3.msra.mxu1 %v3319_v27  ;;  %v1514_v27 = vrot.slane %v4719_v32, %v1513_v23 }
 0x927   :  { %v3770_v33 = vpop.f32.mrb[12].mxu1 }
 0x928   :  { %v1389_v34 = vpop.f32.mrb[13].mxu1 }
 0x929   :  { %3773 = vmatprep.mubr.msk.f32.mxu1 %vm339_vm2, %v1389_v34 }
 0x92a   :  { %3774 = vmatmul.mubr.msk.f32.vlgmr.msra.gmra.mrb[6].mxu1 %vm339_vm2, %v3770_v33 }
 0x9fd   :  { %v3775_v37 = vpop.f32.mrb[6].mxu1 }
 0x9fe   :  { %v4857_v1 = vadd.f32 %v3775_v37, %v332_v5  ;;  %v1470_v39 = vpop.f32.mrb[7].mxu1 }
 0x9ff   :  { %v4859_v40 = vadd.f32 %v1470_v39, %v331_v38  ;;  %v3336_v38 = vld [vmem:[%s5322_s4 + $0x180] sm:$0xff]  ;;  %v3337_v39 = vld [vmem:[%s5322_s4 + $0x188] sm:$0xff] }
 0xa00   :  { %1483 = vadd.xlane.f32.xlu1 %v4857_v1  ;;  %v4167_v41 = vpack.c.bf16 %v3337_v39, %v3336_v38 }
 0xa01   :  { %1481 = vadd.xlane.f32.xlu0 %v4859_v40 }
 0xa02   :  { %4168 = vmatprep.subr.bf16.mxu1 %v4167_v41 }
 0xa03   :  { %4170 = vmatpush3.bf16.msra.mxu1 %v4167_v41 }
 0xa04   :  { %4172 = vmatprep.subr.bf16.mxu1 %v4171_v42 }
 0xa07   :  { %4174 = vmatpush3.bf16.msra.mxu1 %v4171_v42 }
 0xa8d   :  { %v1484_v48 = vpop.xlane.xlu1 %1483 }
 0xa8e   :  { %v1486_v50 = vmul.f32 0.03125, %v1484_v48  ;;  %v1482_v52 = vpop.xlane.xlu0 %1481  ;;  %v4175_v48 = vpack.c.bf16 %v3341_v46, %v3340_v45 }
 0xa8f   :  { %v1485_v53 = vmul.f32 0.03125, %v1482_v52  ;;  %v3343_v52 = vld [vmem:[%s5322_s4 + $0x1b8] sm:$0xff] }
 0xa90   :  { %v1488_v54 = vsub.f32 %v4857_v1, %v1486_v50  ;;  %4176 = vmatprep.subr.bf16.mxu1 %v4175_v48  ;;  %v3342_v50 = vld [vmem:[%s5322_s4 + $0x1b0] sm:$0xff] }
 0xa91   :  { %v1487_v55 = vsub.f32 %v4859_v40, %v1485_v53  ;;  %4178 = vmatpush3.bf16.msra.mxu1 %v4175_v48  ;;  %v4179_v53 = vpack.c.bf16 %v3343_v52, %v3342_v50 }
 0xa92   :  { %v1490_v59 = vmul.f32 %v4670_v60, %v1488_v54  ;;  %v3344_v54 = vld [vmem:[%s5322_s4 + $0x1c0] sm:$0xff] }
 0xa93   :  { %v1489_v56 = vmul.f32 %v4670_v60, %v1487_v55  ;;  %4180 = vmatprep.subr.bf16.mxu1 %v4179_v53  ;;  %v3345_v55 = vld [vmem:[%s5322_s4 + $0x1c8] sm:$0xff] }
 0xa94   :  { %v1492_v61 = vmul.f32 %v1490_v59, %v1490_v59 }
 0xa95   :  { %v1491_v57 = vmul.f32 %v1489_v56, %v1489_v56  ;;  %4182 = vmatpush3.bf16.msra.mxu1 %v4179_v53 }
 0xa97   :  { %1493 = vadd.xlane.f32.xlu0 %v1491_v57  ;;  %v3346_v57 = vld [vmem:[%s5322_s4 + $0x1d0] sm:$0xff] }
 0xa9b   :  { %1495 = vadd.xlane.f32.xlu0 %v1492_v61 }
 0xb24   :  { %v1494_v17 = vpop.xlane.xlu0 %1493 }
 0xb25   :  { %v1497_v51 = vmul.f32 0.03125, %v1494_v17 }
 0xb27   :  { %v1499_v18 = vadd.f32 1e-06, %v1497_v51 }
 0xb28   :  { %v1496_v19 = vpop.xlane.xlu0 %1495 }
 0xb29   :  { %4483 = vrsqrt.f32 %v1499_v18  ;;  %v1498_v20 = vmul.f32 0.03125, %v1496_v19 }
 0xb2b   :  { %v1500_v21 = vadd.f32 1e-06, %v1498_v20 }
 0xb2d   :  { %4485 = vrsqrt.f32 %v1500_v21 }
 0xb33   :  { %v4484_v25 = vpop.eup %4483 }
 0xb34   :  { %v1503_v26 = vmul.f32 %v4484_v25, %v1489_v56  ;;  %v4183_v56 = vpack.c.bf16 %v3345_v55, %v3344_v54 }
 0xb36   :  { %v1509_v28 = vmul.f32 %v1508_v24, %v1503_v26  ;;  %4184 = vmatprep.subr.bf16.mxu1 %v4183_v56 }
 0xb37   :  { %v4486_v33 = vpop.eup %4485  ;;  %4186 = vmatpush3.bf16.msra.mxu1 %v4183_v56 }
 0xb38   :  { %v1515_v34 = vadd.f32 %v1514_v27, %v1509_v28  ;;  %v1504_v36 = vmul.f32 %v4486_v33, %v1490_v59  ;;  %v3347_v59 = vld [vmem:[%s5322_s4 + $0x1d8] sm:$0xff] }
 0xb39   :  { %v4187_v61 = vpack.c.bf16 %v3347_v59, %v3346_v57 }
 0xb3a   :  { %3808 = vmatprep.mubr.f32.mxu0 %v1515_v34  ;;  %v1510_v5 = vmul.f32 %v1508_v24, %v1504_v36 }
 0xb3b   :  { %4188 = vmatprep.subr.bf16.mxu1 %v4187_v61 }
 0xb3c   :  { %v1516_v37 = vadd.f32 %v1514_v27, %v1510_v5  ;;  %4190 = vmatpush3.bf16.msra.mxu1 %v4187_v61 }
 0xb3d   :  { %4192 = vmatprep.subr.bf16.mxu1 %v4191_v63 }
 0xb3e   :  { %3809 = vmatmul.mubr.f32.vlgmr.msra.gmra.mrb[10].mxu0 %v1516_v37 }
 0xb40   :  { %4194 = vmatpush3.bf16.msra.mxu1 %v4191_v63 }
 0xb41   :  { %4196 = vmatprep.subr.bf16.mxu1 %v4195_v3 }
 0xb44   :  { %4198 = vmatpush3.bf16.msra.mxu1 %v4195_v3 }
 0xc11   :  { %v3810_v7 = vpop.f32.mrb[10].mxu0 }
 0xc12   :  { %v1593_v8 = vadd.f32 %v3810_v7, %v1520_v6  ;;  %v1587_v9 = vpop.f32.mrb[11].mxu0 }
 0xc13   :  { %v1588_v10 = vadd.f32 %v1587_v9, %v1520_v6 }
 0xc14   :  { %v1597_v11 = vand.u32 2147483647, %v1593_v8  ;;  %vm1639_vm5 = vcmp.lt.f32.partialorder %v1593_v8, 0.0  ;;  %v1645_v7 = vmul.f32 0.5, %v1593_v8 }
 0xc15   :  { %v1596_v12 = vand.u32 2147483647, %v1588_v10  ;;  %vm1638_vm6 = vcmp.lt.f32.partialorder %v1588_v10, 0.0  ;;  %v1644_v3 = vmul.f32 0.5, %v1588_v10  ;;  %v3385_v10 = vld [vmem:[%s5322_s4 + $0x200] sm:$0xff] }
 0xc16   :  { %v1599_v13 = vmul.f32 0.70710677, %v1597_v11 }
 0xc17   :  { %v1598_v14 = vmul.f32 0.70710677, %v1596_v12  ;;  %v1652_v12 = vsub.s32 7, %v4712_v29 }
 0xc18   :  { %v1601_v15 = vmul.f32 0.3275911, %v1599_v13  ;;  %v1627_v18 = vmul.f32 %v1599_v13, %v1599_v13 }
 0xc19   :  { %v1600_v16 = vmul.f32 0.3275911, %v1598_v14  ;;  %v1626_v19 = vmul.f32 %v1598_v14, %v1598_v14  ;;  %v1653_v13 = vrot.slane %v4719_v32, %v1652_v12  ;;  %v3386_v32 = vld [vmem:[%s5322_s4 + $0x208] sm:$0xff] }
 0xc1a   :  { %v1603_v17 = vadd.f32 1.0, %v1601_v15  ;;  %v1629_v21 = vsub.f32 0.0, %v1627_v18  ;;  %v4199_v18 = vpack.c.bf16 %v3386_v32, %v3385_v10 }
 0xc1b   :  { %v1602_v51 = vadd.f32 1.0, %v1600_v16  ;;  %v1628_v26 = vsub.f32 0.0, %v1626_v19 }
 0xc1c   :  { %4487 = vrcp.f32 %v1603_v17  ;;  %v1632_v33 = vmul.f32 1.442695, %v1629_v21  ;;  %4200 = vmatprep.subr.bf16.mxu0 %v4199_v18 }
 0xc1d   :  { %4489 = vrcp.f32 %v1602_v51  ;;  %v1630_v5 = vmul.f32 1.442695, %v1628_v26  ;;  %4202 = vmatpush3.bf16.msra.mxu0 %v4199_v18 }
 0xc1e   :  { %4491 = vpow2.f32 %v1632_v33 }
 0xc1f   :  { %4493 = vpow2.f32 %v1630_v5  ;;  %v3389_v5 = vld [vmem:[%s5322_s4 + $0x220] sm:$0xff] }
 0xc26   :  { %v4488_v20 = vpop.eup %4487 }
 0xc27   :  { %v4490_v24 = vpop.eup %4489  ;;  %v1609_v25 = vmul.f32 1.0614054, %v4488_v20 }
 0xc28   :  { %v1608_v27 = vmul.f32 1.0614054, %v4490_v24  ;;  %v4492_v53 = vpop.eup %4491 }
 0xc29   :  { %v1611_v28 = vadd.f32 -1.4531521, %v1609_v25  ;;  %v4494_v55 = vpop.eup %4493 }
 0xc2a   :  { %v1610_v34 = vadd.f32 -1.4531521, %v1608_v27 }
 0xc2b   :  { %v1613_v36 = vmul.f32 %v4488_v20, %v1611_v28 }
 0xc2c   :  { %v1612_v37 = vmul.f32 %v4490_v24, %v1610_v34 }
 0xc2d   :  { %v1615_v38 = vadd.f32 1.4214138, %v1613_v36 }
 0xc2e   :  { %v1614_v39 = vadd.f32 1.4214138, %v1612_v37  ;;  %v3390_v37 = vld [vmem:[%s5322_s4 + $0x228] sm:$0xff] }
 0xc2f   :  { %v1617_v41 = vmul.f32 %v4488_v20, %v1615_v38  ;;  %v4207_v38 = vpack.c.bf16 %v3390_v37, %v3389_v5 }
 0xc30   :  { %v1616_v47 = vmul.f32 %v4490_v24, %v1614_v39  ;;  %v3391_v39 = vld [vmem:[%s5322_s4 + $0x230] sm:$0xff] }
 0xc31   :  { %v1619_v43 = vadd.f32 -0.28449672, %v1617_v41  ;;  %v3392_v41 = vld [vmem:[%s5322_s4 + $0x238] sm:$0xff] }
 0xc32   :  { %v1618_v42 = vadd.f32 -0.28449672, %v1616_v47  ;;  %v4211_v47 = vpack.c.bf16 %v3392_v41, %v3391_v39 }
 0xc33   :  { %v1621_v45 = vmul.f32 %v4488_v20, %v1619_v43  ;;  %v3393_v43 = vld [vmem:[%s5322_s4 + $0x240] sm:$0xff] }
 0xc34   :  { %v1620_v46 = vmul.f32 %v4490_v24, %v1618_v42  ;;  %v3394_v42 = vld [vmem:[%s5322_s4 + $0x248] sm:$0xff] }
 0xc35   :  { %v1623_v48 = vadd.f32 0.2548296, %v1621_v45  ;;  %v4215_v45 = vpack.c.bf16 %v3394_v42, %v3393_v43 }
 0xc36   :  { %v1622_v50 = vadd.f32 0.2548296, %v1620_v46  ;;  %v3395_v46 = vld [vmem:[%s5322_s4 + $0x250] sm:$0xff] }
 0xc37   :  { %v1625_v52 = vmul.f32 %v4488_v20, %v1623_v48  ;;  %v3396_v48 = vld [vmem:[%s5322_s4 + $0x258] sm:$0xff] }
 0xc38   :  { %v1624_v54 = vmul.f32 %v4490_v24, %v1622_v50  ;;  %v4219_v50 = vpack.c.bf16 %v3396_v48, %v3395_v46 }
 0xc39   :  { %v1635_v56 = vmul.f32 %v4492_v53, %v1625_v52  ;;  %v3397_v52 = vld [vmem:[%s5322_s4 + $0x260] sm:$0xff]  ;;  %v3398_v53 = vld [vmem:[%s5322_s4 + $0x268] sm:$0xff] }
 0xc3a   :  { %v1634_v57 = vmul.f32 %v4494_v55, %v1624_v54  ;;  %v4223_v54 = vpack.c.bf16 %v3398_v53, %v3397_v52  ;;  %v3399_v55 = vld [vmem:[%s5322_s4 + $0x270] sm:$0xff] }
 0xc3b   :  { %v1637_v59 = vsub.f32 1.0, %v1635_v56  ;;  %v3400_v56 = vld [vmem:[%s5322_s4 + $0x278] sm:$0xff] }
 0xc3c   :  { %v1636_v61 = vsub.f32 1.0, %v1634_v57  ;;  %v4227_v57 = vpack.c.bf16 %v3400_v56, %v3399_v55 }
 0xc3d   :  { %v1641_v49 = vsub.f32 0.0, %v1637_v59 }
 0xc3e   :  { %v1640_v62 = vsub.f32 0.0, %v1636_v61 }
 0xc3f   :  { %v1643_v63 = vsel %vm1639_vm5, %v1641_v49, %v1637_v59 }
 0xc40   :  { %v1647_v0 = vadd.f32 1.0, %v1643_v63  ;;  %v1642_v2 = vsel %vm1638_vm6, %v1640_v62, %v1636_v61 }
 0xc41   :  { %v1646_v6 = vadd.f32 1.0, %v1642_v2  ;;  %v5042_v2 = vld [vmem:[%s5323_s5 + $0x8] sm:$0xff] }
 0xc42   :  { %v1649_v11 = vmul.f32 %v1647_v0, %v1645_v7  ;;  %v1828_v10 = vrot.slane %v5042_v2, %v250_v44 }
 0xc43   :  { %v1648_v9 = vmul.f32 %v1646_v6, %v1644_v3  ;;  %v1816_v3 = vrot.slane %v5042_v2, %v238_v30 }
 0xc45   :  { %3843 = vmatprep.mubr.f32.mxu1 %v1648_v9  ;;  %v1822_v9 = vrot.slane %v5042_v2, %v244_v31 }
 0xc46   :  { %3844 = vmatmul.mubr.f32.vlgmr.msra.gmra.mrb[14].mxu1 %v1649_v11 }
 0xd19   :  { %v3845_v14 = vpop.f32.mrb[14].mxu1 }
 0xd1a   :  { %v1720_v15 = vpop.f32.mrb[15].mxu1  ;;  %v1726_v17 = vadd.f32 %v3845_v14, %v1653_v13 }
 0xd1b   :  { %v1721_v16 = vadd.f32 %v1720_v15, %v1653_v13 }
 0xd1c   :  { %v4984_v8 = vadd.f32 %v4857_v1, %v1726_v17  ;;  %v3388_v1 = vld [vmem:[%s5322_s4 + $0x218] sm:$0xff] }
 0xd1d   :  { %v4980_v51 = vadd.f32 %v4859_v40, %v1721_v16  ;;  %v3387_v40 = vld [vmem:[%s5322_s4 + $0x210] sm:$0xff] }
 0xd1e   :  { %v4203_v19 = vpack.c.bf16 %v3388_v1, %v3387_v40 }
 0xd1f   :  { %1789 = vadd.xlane.f32.xlu0 %v4980_v51 }
 0xd20   :  { %4204 = vmatprep.subr.bf16.mxu0 %v4203_v19 }
 0xd21   :  { %4206 = vmatpush3.bf16.msra.mxu0 %v4203_v19 }
 0xd22   :  { %4208 = vmatprep.subr.bf16.mxu0 %v4207_v38 }
 0xd23   :  { %1791 = vadd.xlane.f32.xlu0 %v4984_v8 }
 0xd25   :  { %4210 = vmatpush3.bf16.msra.mxu0 %v4207_v38  ;;  %v5096_v38 = vld [vmem:[%s5321_s3 + $0x8] sm:$0xff] }
 0xd26   :  { %4212 = vmatprep.subr.bf16.mxu0 %v4211_v47 }
 0xd29   :  { %4214 = vmatpush3.bf16.msra.mxu0 %v4211_v47 }
 0xd2a   :  { %4216 = vmatprep.subr.bf16.mxu0 %v4215_v45 }
 0xd2d   :  { %4218 = vmatpush3.bf16.msra.mxu0 %v4215_v45 }
 0xd2e   :  { %4220 = vmatprep.subr.bf16.mxu0 %v4219_v50 }
 0xd31   :  { %4222 = vmatpush3.bf16.msra.mxu0 %v4219_v50 }
 0xd32   :  { %4224 = vmatprep.subr.bf16.mxu0 %v4223_v54 }
 0xd35   :  { %4226 = vmatpush3.bf16.msra.mxu0 %v4223_v54 }
 0xd36   :  { %4228 = vmatprep.subr.bf16.mxu0 %v4227_v57 }
 0xd39   :  { %4230 = vmatpush3.bf16.msra.mxu0 %v4227_v57 }
 0xdac   :  { %v1790_v20 = vpop.xlane.xlu0 %1789 }
 0xdad   :  { %v1793_v21 = vmul.f32 0.03125, %v1790_v20 }
 0xdaf   :  { %v1795_v24 = vsub.f32 %v4980_v51, %v1793_v21 }
 0xdb0   :  { %v1792_v25 = vpop.xlane.xlu0 %1791 }
 0xdb1   :  { %v1794_v26 = vmul.f32 0.03125, %v1792_v25  ;;  %v1797_v27 = vmul.f32 %v4670_v60, %v1795_v24 }
 0xdb3   :  { %v1796_v28 = vsub.f32 %v4984_v8, %v1794_v26  ;;  %v1799_v33 = vmul.f32 %v1797_v27, %v1797_v27 }
 0xdb5   :  { %1801 = vadd.xlane.f32.xlu0 %v1799_v33  ;;  %v1798_v34 = vmul.f32 %v4670_v60, %v1796_v28 }
 0xdb7   :  { %v1800_v36 = vmul.f32 %v1798_v34, %v1798_v34 }
 0xdb9   :  { %1803 = vadd.xlane.f32.xlu1 %v1800_v36  ;;  %v5089_v36 = vld [vmem:[%s5321_s3] sm:$0xff] }
 0xe42   :  { %v1802_v59 = vpop.xlane.xlu0 %1801 }
 0xe43   :  { %v1805_v61 = vmul.f32 0.03125, %v1802_v59 }
 0xe45   :  { %v1807_v49 = vadd.f32 1e-06, %v1805_v61 }
 0xe46   :  { %v1804_v62 = vpop.xlane.xlu1 %1803 }
 0xe47   :  { %4495 = vrsqrt.f32 %v1807_v49  ;;  %v1806_v63 = vmul.f32 0.03125, %v1804_v62 }
 0xe49   :  { %v1808_v0 = vadd.f32 1e-06, %v1806_v63  ;;  %v3401_v63 = vld [vmem:[%s5322_s4 + $0x280] sm:$0xff] }
 0xe4b   :  { %4497 = vrsqrt.f32 %v1808_v0 }
 0xe51   :  { %v4496_v6 = vpop.eup %4495 }
 0xe52   :  { %v1811_v7 = vmul.f32 %v4496_v6, %v1797_v27 }
 0xe54   :  { %v1817_v11 = vmul.f32 %v1816_v3, %v1811_v7 }
 0xe55   :  { %v4498_v13 = vpop.eup %4497 }
 0xe56   :  { %v1823_v14 = vadd.f32 %v1822_v9, %v1817_v11  ;;  %v1812_v15 = vmul.f32 %v4498_v13, %v1798_v34 }
 0xe58   :  { %3878 = vmatprep.mubr.f32.mxu0 %v1823_v14  ;;  %v1818_v16 = vmul.f32 %v1816_v3, %v1812_v15 }
 0xe5a   :  { %v1824_v17 = vadd.f32 %v1822_v9, %v1818_v16 }
 0xe5c   :  { %3879 = vmatmul.mubr.f32.vlgmr.msra.gmra.mrb[12].mxu0 %v1824_v17 }
 0xf2f   :  { %v3880_v32 = vpop.f32.mrb[12].mxu0 }
 0xf30   :  { %v5053_v30 = vadd.f32 %v3880_v32, %v1828_v10  ;;  %v1895_v40 = vpop.f32.mrb[13].mxu0 }
 0xf31   :  { %v5055_v18 = vadd.f32 %v1895_v40, %v1828_v10 }
 0xf33   :  { %3885 = vmatprep.mubr.msk.f32.mxu1 %vm339_vm2, %v5055_v18  ;;  %v5061_v31 = vpack.i.bf16 %v5053_v30, %v5055_v18 }
 0xf35   :  { %4408 = vrot.lane.b32.xlu0 %v5061_v31, %s4575_s28 }
 0xf39   :  { %4418 = vrot.lane.b32.xlu0 %v5061_v31, %s4574_s27 }
 0xf3d   :  { %2195 = vrot.lane.b32.xlu0 %v5055_v18, %s4576_s29 }
 0xf41   :  { %2197 = vrot.lane.b32.xlu0 %v5053_v30, %s4576_s29 }
 0xf45   :  { %2482 = vrot.lane.b32.xlu0 %v5055_v18, %s4578_s1 }
 0xfa7   :  { %v4409_v44 = vpop.permute.xlu0 %4408 }
 0xfa8   :  { %v4411_v1 = vunpack.i.h.bf16 %v4409_v44  ;;  %v4410_v19 = vunpack.i.l.bf16 %v4409_v44 }
 0xfaa   :  { %v4231_v20 = vpack.c.bf16 %v4411_v1, %v4410_v19 }
 0xfab   :  { %v5073_v21 = vpop.permute.xlu0 %4418 }
 0xfac   :  { %4233 = vmatprep.subr.msk.bf16.mxu1 %vm4742_vm3, %v4231_v20  ;;  %v4421_v9 = vunpack.i.h.bf16 %v5073_v21  ;;  %v4420_v11 = vunpack.i.l.bf16 %v5073_v21 }
 0xfad   :  { %4236 = vmatpush3.bf16.xpose.msk.msra.mxu1 %vm4742_vm3, %v4231_v20 }
 0xfae   :  { %v4241_v16 = vpack.c.bf16 %v4421_v9, %v4420_v11 }
 0xfaf   :  { %v5079_v24 = vpop.permute.xlu0 %2195 }
 0xfb3   :  { %v5081_v25 = vpop.permute.xlu0 %2197 }
 0xfb4   :  { %3886 = vmatmul.mubr.msk.f32.vlgmr.msra.gmra.mrb[16].mxu1 %vm339_vm2, %v5053_v30 }
 0xfb7   :  { %v2483_v26 = vpop.permute.xlu0 %2482 }
 0xfb8   :  { %3923 = vmatprep.mubr.msk.f32.mxu0 %vm339_vm2, %v2483_v26 }
0x1087   :  { %v3887_v27 = vpop.f32.mrb[16].mxu1 }
0x1088   :  { %v1990_v28 = vpop.f32.mrb[17].mxu1  ;;  %v2000_v33 = vmul.f32 0.35355338, %v3887_v27 }
0x1089   :  { %v1999_v34 = vmul.f32 0.35355338, %v1990_v28 }
0x108a   :  { %v2002_v39 = vadd.f32 %v5096_v38, %v2000_v33 }
0x108b   :  { %v2001_v5 = vadd.f32 %v5089_v36, %v1999_v34 }
0x108c   :  { %v2006_v41 = vsel %vm427_vm4, %v2002_v39, -inf }
0x108d   :  { %v2003_v37 = vsel %vm427_vm4, %v2001_v5, -inf }
0x108e   :  { %2004 = vmax.xlane.f32.xlu1 %v2003_v37 }
0x1092   :  { %2007 = vmax.xlane.f32.xlu1 %v2006_v41 }
0x111b   :  { %v2005_v47 = vpop.xlane.xlu1 %2004 }
0x111c   :  { %v2009_v43 = vsub.f32 %v2001_v5, %v2005_v47 }
0x111e   :  { %v2011_v46 = vmul.f32 1.442695, %v2009_v43 }
0x111f   :  { %v2008_v42 = vpop.xlane.xlu1 %2007 }
0x1120   :  { %v2010_v45 = vsub.f32 %v2002_v39, %v2008_v42 }
0x1122   :  { %v2013_v48 = vmul.f32 1.442695, %v2010_v45 }
0x1124   :  { %4499 = vpow2.f32 %v2013_v48 }
0x1125   :  { %4501 = vpow2.f32 %v2011_v46 }
0x112e   :  { %v4500_v50 = vpop.eup %4499 }
0x112f   :  { %v2018_v52 = vsel %vm427_vm4, %v4500_v50, 0.0  ;;  %v4502_v53 = vpop.eup %4501 }
0x1130   :  { %2019 = vadd.xlane.f32.xlu1 %v2018_v52  ;;  %v2015_v54 = vsel %vm427_vm4, %v4502_v53, 0.0 }
0x1134   :  { %2016 = vadd.xlane.f32.xlu1 %v2015_v54 }
0x1145   :  { %4413 = vrot.lane.b32.xlu1 %v5061_v31, %s4581_s13 }
0x1149   :  { %4423 = vrot.lane.b32.xlu1 %v5061_v31, %s4577_s10 }
0x114d   :  { %2484 = vrot.lane.b32.xlu1 %v5053_v30, %s4578_s1 }
0x11bd   :  { %v2020_v55 = vpop.xlane.xlu1 %2019 }
0x11be   :  { %4503 = vrcp.f32 %v2020_v55 }
0x11c1   :  { %v2017_v56 = vpop.xlane.xlu1 %2016 }
0x11c2   :  { %4505 = vrcp.f32 %v2017_v56 }
0x11c5   :  { %v4414_v57 = vpop.permute.xlu1 %4413 }
0x11c6   :  { %v4416_v59 = vunpack.i.h.bf16 %v4414_v57  ;;  %v4415_v61 = vunpack.i.l.bf16 %v4414_v57 }
0x11c8   :  { %v4237_v49 = vpack.c.bf16 %v4416_v59, %v4415_v61  ;;  %v4504_v6 = vpop.eup %4503 }
0x11c9   :  { %v4424_v62 = vpop.permute.xlu1 %4423  ;;  %v2024_v15 = vmul.f32 %v4504_v6, %v4500_v50 }
0x11ca   :  { %v4426_v0 = vunpack.i.h.bf16 %v4424_v62  ;;  %v4425_v3 = vunpack.i.l.bf16 %v4424_v62  ;;  %4238 = vmatprep.subr.bf16.mxu1 %v4237_v49 }
0x11cb   :  { %4240 = vmatpush3.bf16.msra.mxu1 %v4237_v49 }
0x11cc   :  { %v4506_v7 = vpop.eup %4505  ;;  %v4251_v13 = vpack.c.bf16 %v4426_v0, %v4425_v3  ;;  %3895 = vmatprep.subr.mxu1 %v3401_v63 }
0x11cd   :  { %v2022_v14 = vmul.f32 %v4506_v7, %v4502_v53  ;;  %v2485_v17 = vpop.permute.xlu1 %2484 }
0x11ce   :  { %4253 = vmatprep.subr.msk.bf16.mxu0 %vm4742_vm3, %v4251_v13 }
0x11cf   :  { %3892 = vmatprep.mubr.msk.f32.mxu1 %vm427_vm4, %v2022_v14  ;;  %4256 = vmatpush3.bf16.xpose.msk.msra.mxu0 %vm4742_vm3, %v4251_v13 }
0x11d0   :  { %3893 = vmatmul.mubr.msk.f32.vlgmr.msra.gmra.mrb[18].mxu1 %vm427_vm4, %v2024_v15 }
0x11d1   :  { %3896 = vmatpush3.msra.mxu1 %v3401_v63 }
0x11d2   :  { %4243 = vmatprep.subr.msk.bf16.mxu1 %vm4742_vm3, %v4241_v16 }
0x11d6   :  { %3924 = vmatmul.mubr.msk.f32.vlgmr.msra.gmra.mrb[14].mxu0 %vm339_vm2, %v2485_v17 }
0x12a3   :  { %v3894_v10 = vpop.f32.mrb[18].mxu1 }
0x12a4   :  { %v2103_v32 = vpop.f32.mrb[19].mxu1 }
0x12a5   :  { %3897 = vmatprep.mubr.msk.f32.mxu1 %vm339_vm2, %v2103_v32 }
0x12a6   :  { %3898 = vmatmul.mubr.msk.f32.vlgmr.msra.gmra.mrb[20].mxu1 %vm339_vm2, %v3894_v10 }
0x12a7   :  { %4246 = vmatpush3.bf16.xpose.msk.msra.mxu1 %vm4742_vm3, %v4241_v16  ;;  %3904 = vmatprep.mubr.msk.f32.mxu1 %vm339_vm2, %v5079_v24 }
0x12a9   :  { %v3925_v40 = vpop.f32.mrb[14].mxu0 }
0x12aa   :  { %v2564_v44 = vpop.f32.mrb[15].mxu0  ;;  %v2574_v24 = vmul.f32 0.35355338, %v3925_v40 }
0x12ab   :  { %v2573_v55 = vmul.f32 0.35355338, %v2564_v44 }
0x12ad   :  { %v2575_v56 = vadd.f32 %v5089_v36, %v2573_v55 }
0x12ae   :  { %3905 = vmatmul.mubr.msk.f32.vlgmr.msra.gmra.mrb[22].mxu1 %vm339_vm2, %v5081_v25  ;;  %v2576_v25 = vadd.f32 %v5096_v38, %v2574_v24 }
0x12af   :  { %v2577_v58 = vsel %vm427_vm4, %v2575_v56, -inf }
0x12b0   :  { %v2580_v34 = vsel %vm427_vm4, %v2576_v25, -inf }
0x1381   :  { %v3906_v1 = vpop.f32.mrb[22].mxu1 }
0x1382   :  { %v2287_v19 = vmul.f32 0.35355338, %v3906_v1  ;;  %v2277_v20 = vpop.f32.mrb[23].mxu1 }
0x1383   :  { %v2286_v21 = vmul.f32 0.35355338, %v2277_v20 }
0x1384   :  { %v2289_v26 = vadd.f32 %v5096_v38, %v2287_v19 }
0x1385   :  { %v2288_v27 = vadd.f32 %v5089_v36, %v2286_v21 }
0x1386   :  { %v2293_v28 = vsel %vm427_vm4, %v2289_v26, -inf }
0x1387   :  { %2294 = vmax.xlane.f32.xlu1 %v2293_v28  ;;  %v2290_v33 = vsel %vm427_vm4, %v2288_v27, -inf }
0x1388   :  { %2291 = vmax.xlane.f32.xlu0 %v2290_v33  ;;  %v3402_v33 = vld [vmem:[%s5322_s4 + $0x288] sm:$0xff] }
0x1398   :  { %4433 = vrot.lane.b32.xlu1 %v5061_v31, %s4579_s11 }
0x139c   :  { %2769 = vrot.lane.b32.xlu1 %v5055_v18, %s4580_s12 }
0x13a0   :  { %2771 = vrot.lane.b32.xlu1 %v5053_v30, %s4580_s12 }
0x13c4   :  { %2581 = vmax.xlane.f32.xlu1 %v2580_v34 }
0x1414   :  { %v2295_v5 = vpop.xlane.xlu1 %2294 }
0x1415   :  { %v2297_v37 = vsub.f32 %v2289_v26, %v2295_v5  ;;  %v2292_v39 = vpop.xlane.xlu0 %2291 }
0x1416   :  { %v2296_v41 = vsub.f32 %v2288_v27, %v2292_v39 }
0x1417   :  { %v2300_v47 = vmul.f32 1.442695, %v2297_v37 }
0x1418   :  { %v2298_v43 = vmul.f32 1.442695, %v2296_v41  ;;  %v4434_v42 = vpop.permute.xlu1 %4433 }
0x1419   :  { %4507 = vpow2.f32 %v2300_v47  ;;  %v4436_v45 = vunpack.i.h.bf16 %v4434_v42  ;;  %v4435_v46 = vunpack.i.l.bf16 %v4434_v42 }
0x141a   :  { %4509 = vpow2.f32 %v2298_v43 }
0x141b   :  { %v4261_v18 = vpack.c.bf16 %v4436_v45, %v4435_v46 }
0x141c   :  { %v2770_v48 = vpop.permute.xlu1 %2769 }
0x141d   :  { %4263 = vmatprep.subr.msk.bf16.mxu0 %vm4742_vm3, %v4261_v18  ;;  %3942 = vmatprep.mubr.msk.f32.mxu0 %vm339_vm2, %v2770_v48 }
0x141e   :  { %4266 = vmatpush3.bf16.xpose.msk.msra.mxu0 %vm4742_vm3, %v4261_v18 }
0x1420   :  { %v2772_v50 = vpop.permute.xlu1 %2771 }
0x1423   :  { %v4508_v30 = vpop.eup %4507 }
0x1424   :  { %v2305_v52 = vsel %vm427_vm4, %v4508_v30, 0.0  ;;  %v4510_v53 = vpop.eup %4509 }
0x1425   :  { %3943 = vmatmul.mubr.msk.f32.vlgmr.msra.gmra.mrb[16].mxu0 %vm339_vm2, %v2772_v50  ;;  %2306 = vadd.xlane.f32.xlu0 %v2305_v52  ;;  %v2302_v54 = vsel %vm427_vm4, %v4510_v53, 0.0 }
0x1429   :  { %2303 = vadd.xlane.f32.xlu0 %v2302_v54 }
0x143f   :  { %4428 = vrot.lane.b32.xlu0 %v5061_v31, %s4582_s16 }
0x1451   :  { %v2582_v9 = vpop.xlane.xlu1 %2581 }
0x1452   :  { %v2584_v11 = vsub.f32 %v2576_v25, %v2582_v9 }
0x1454   :  { %v2587_v15 = vmul.f32 1.442695, %v2584_v11 }
0x145e   :  { %2578 = vmax.xlane.f32.xlu0 %v2577_v58 }
0x14b2   :  { %v2307_v57 = vpop.xlane.xlu0 %2306 }
0x14b3   :  { %4511 = vrcp.f32 %v2307_v57 }
0x14b6   :  { %v2304_v59 = vpop.xlane.xlu0 %2303 }
0x14b7   :  { %4513 = vrcp.f32 %v2304_v59 }
0x14ba   :  { %v4429_v61 = vpop.permute.xlu0 %4428 }
0x14bb   :  { %v4431_v49 = vunpack.i.h.bf16 %v4429_v61  ;;  %v4430_v62 = vunpack.i.l.bf16 %v4429_v61 }
0x14bd   :  { %v4247_v63 = vpack.c.bf16 %v4431_v49, %v4430_v62  ;;  %v4512_v0 = vpop.eup %4511 }
0x14be   :  { %v2311_v7 = vmul.f32 %v4512_v0, %v4508_v30 }
0x14bf   :  { %4248 = vmatprep.subr.bf16.mxu1 %v4247_v63 }
0x14c0   :  { %4250 = vmatpush3.bf16.msra.mxu1 %v4247_v63 }
0x14c1   :  { %v4514_v3 = vpop.eup %4513  ;;  %3914 = vmatprep.subr.mxu1 %v3402_v33 }
0x14c2   :  { %v2309_v6 = vmul.f32 %v4514_v3, %v4510_v53 }
0x14c4   :  { %3911 = vmatprep.mubr.msk.f32.mxu1 %vm427_vm4, %v2309_v6 }
0x14c5   :  { %3912 = vmatmul.mubr.msk.f32.vlgmr.msra.gmra.mrb[24].mxu1 %vm427_vm4, %v2311_v7  ;;  %v3404_v7 = vld [vmem:[%s5322_s4 + $0x298] sm:$0xff] }
0x14c6   :  { %3915 = vmatpush3.msra.mxu1 %v3402_v33 }
0x14eb   :  { %v2579_v13 = vpop.xlane.xlu0 %2578 }
0x14ec   :  { %v2583_v14 = vsub.f32 %v2575_v56, %v2579_v13  ;;  %v3403_v56 = vld [vmem:[%s5322_s4 + $0x290] sm:$0xff] }
0x14ee   :  { %v2585_v16 = vmul.f32 1.442695, %v2583_v14  ;;  %v1907_v14 = vrot.slane %v5042_v2, %v329_v35  ;;  %v3406_v35 = vld [vmem:[%s5322_s4 + $0x308] sm:$0xff] }
0x14f0   :  { %4515 = vpow2.f32 %v2585_v16 }
0x14f1   :  { %4517 = vpow2.f32 %v2587_v15  ;;  %v1909_v15 = vadd.f32 %v1907_v14, %v4984_v8 }
0x14f8   :  { %v3944_v17 = vpop.f32.mrb[16].mxu0 }
0x14f9   :  { %v2851_v10 = vpop.f32.mrb[17].mxu0  ;;  %v2861_v40 = vmul.f32 0.35355338, %v3944_v17  ;;  %v1908_v17 = vadd.f32 %v1907_v14, %v4980_v51  ;;  %v3407_v51 = vld [vmem:[%s5322_s4 + $0x310] sm:$0xff] }
0x14fa   :  { %v4516_v32 = vpop.eup %4515  ;;  %v2860_v44 = vmul.f32 0.35355338, %v2851_v10 }
0x14fb   :  { %v2589_v1 = vsel %vm427_vm4, %v4516_v32, 0.0  ;;  %v4518_v19 = vpop.eup %4517  ;;  %v2863_v26 = vadd.f32 %v5096_v38, %v2861_v40 }
0x14fc   :  { %2590 = vadd.xlane.f32.xlu0 %v2589_v1  ;;  %v2862_v20 = vadd.f32 %v5089_v36, %v2860_v44  ;;  %v2592_v27 = vsel %vm427_vm4, %v4518_v19, 0.0  ;;  %v3405_v44 = vld [vmem:[%s5322_s4 + $0x300] sm:$0xff]  ;;  %v3408_v1 = vld [vmem:[%s5322_s4 + $0x318] sm:$0xff] }
0x14fd   :  { %v2867_v28 = vsel %vm427_vm4, %v2863_v26, -inf  ;;  %v4271_v8 = vpack.c.bf16 %v3406_v35, %v3405_v44  ;;  %v3427_v35 = vld [vmem:[%s5322_s4 + $0x3b0] sm:$0xff] }
0x14fe   :  { %v2864_v21 = vsel %vm427_vm4, %v2862_v20, -inf }
0x14ff   :  { %2865 = vmax.xlane.f32.xlu1 %v2864_v21  ;;  %4272 = vmatprep.subr.bf16.mxu0 %v4271_v8 }
0x1500   :  { %2593 = vadd.xlane.f32.xlu0 %v2592_v27  ;;  %4274 = vmatpush3.bf16.msra.mxu0 %v4271_v8 }
0x1503   :  { %2868 = vmax.xlane.f32.xlu1 %v2867_v28 }
0x1516   :  { %4438 = vrot.lane.b32.xlu0 %v5061_v31, %s4583_s19 }
0x1589   :  { %v2591_v36 = vpop.xlane.xlu0 %2590 }
0x158a   :  { %4519 = vrcp.f32 %v2591_v36 }
0x158c   :  { %v2866_v24 = vpop.xlane.xlu1 %2865 }
0x158d   :  { %v2870_v38 = vsub.f32 %v2862_v20, %v2866_v24  ;;  %v2594_v25 = vpop.xlane.xlu0 %2593 }
0x158e   :  { %4521 = vrcp.f32 %v2594_v25 }
0x158f   :  { %v2872_v34 = vmul.f32 1.442695, %v2870_v38 }
0x1590   :  { %v2869_v5 = vpop.xlane.xlu1 %2868 }
0x1591   :  { %4523 = vpow2.f32 %v2872_v34  ;;  %v2871_v37 = vsub.f32 %v2863_v26, %v2869_v5  ;;  %v4439_v39 = vpop.permute.xlu0 %4438  ;;  %v3409_v34 = vld [vmem:[%s5322_s4 + $0x320] sm:$0xff]  ;;  %v3410_v5 = vld [vmem:[%s5322_s4 + $0x328] sm:$0xff] }
0x1592   :  { %v4441_v41 = vunpack.i.h.bf16 %v4439_v39  ;;  %v4440_v47 = vunpack.i.l.bf16 %v4439_v39  ;;  %v3411_v39 = vld [vmem:[%s5322_s4 + $0x330] sm:$0xff] }
0x1593   :  { %v2874_v43 = vmul.f32 1.442695, %v2871_v37  ;;  %v4279_v37 = vpack.c.bf16 %v3410_v5, %v3409_v34  ;;  %v3095_v34 = vrot.slane %v5042_v2, %v1519_v4 }
0x1594   :  { %v4257_v42 = vpack.c.bf16 %v4441_v41, %v4440_v47  ;;  %v4520_v45 = vpop.eup %4519  ;;  %v3413_v47 = vld [vmem:[%s5322_s4 + $0x340] sm:$0xff] }
0x1595   :  { %4525 = vpow2.f32 %v2874_v43  ;;  %v2596_v30 = vmul.f32 %v4520_v45, %v4516_v32  ;;  %v3414_v43 = vld [vmem:[%s5322_s4 + $0x348] sm:$0xff]  ;;  %v3415_v45 = vld [vmem:[%s5322_s4 + $0x350] sm:$0xff] }
0x1596   :  { %4258 = vmatprep.subr.bf16.mxu1 %v4257_v42 }
0x1598   :  { %v3913_v46 = vpop.f32.mrb[24].mxu1  ;;  %v4522_v48 = vpop.eup %4521 }
0x1599   :  { %v2390_v18 = vpop.f32.mrb[25].mxu1  ;;  %v2598_v53 = vmul.f32 %v4522_v48, %v4518_v19  ;;  %v4275_v19 = vpack.c.bf16 %v3408_v1, %v3407_v51  ;;  %v3417_v48 = vld [vmem:[%s5322_s4 + $0x360] sm:$0xff]  ;;  %v3428_v51 = vld [vmem:[%s5322_s4 + $0x3b8] sm:$0xff] }
0x159a   :  { %3916 = vmatprep.mubr.msk.f32.mxu1 %vm339_vm2, %v2390_v18  ;;  %v4315_v8 = vpack.c.bf16 %v3428_v51, %v3427_v35  ;;  %v3429_v1 = vld [vmem:[%s5322_s4 + $0x3c0] sm:$0xff] }
0x159b   :  { %v4524_v50 = vpop.eup %4523  ;;  %3917 = vmatmul.mubr.msk.f32.vlgmr.msra.gmra.mrb[20].mxu1 %vm339_vm2, %v3913_v46  ;;  %4276 = vmatprep.subr.bf16.mxu0 %v4275_v19  ;;  %v3416_v46 = vld [vmem:[%s5322_s4 + $0x358] sm:$0xff] }
0x159c   :  { %4260 = vmatpush3.bf16.msra.mxu1 %v4257_v42  ;;  %3930 = vmatprep.mubr.msk.f32.mxu1 %vm427_vm4, %v2596_v30  ;;  %v2876_v52 = vsel %vm427_vm4, %v4524_v50, 0.0  ;;  %v4287_v42 = vpack.c.bf16 %v3414_v43, %v3413_v47  ;;  %v4291_v18 = vpack.c.bf16 %v3416_v46, %v3415_v45  ;;  %v3418_v30 = vld [vmem:[%s5322_s4 + $0x368] sm:$0xff] }
0x159d   :  { %2877 = vadd.xlane.f32.xlu1 %v2876_v52  ;;  %3933 = vmatprep.subr.mxu1 %v3403_v56  ;;  %v3419_v52 = vld [vmem:[%s5322_s4 + $0x370] sm:$0xff] }
0x159e   :  { %4278 = vmatpush3.bf16.msra.mxu0 %v4275_v19  ;;  %v3430_v19 = vld [vmem:[%s5322_s4 + $0x3c8] sm:$0xff] }
0x159f   :  { %v4526_v54 = vpop.eup %4525  ;;  %3931 = vmatmul.mubr.msk.f32.vlgmr.msra.gmra.mrb[26].mxu1 %vm427_vm4, %v2598_v53  ;;  %4280 = vmatprep.subr.bf16.mxu0 %v4279_v37  ;;  %v3420_v53 = vld [vmem:[%s5322_s4 + $0x378] sm:$0xff] }
0x15a0   :  { %v2879_v55 = vsel %vm427_vm4, %v4526_v54, 0.0  ;;  %3934 = vmatpush3.msra.mxu1 %v3403_v56 }
0x15a1   :  { %2880 = vadd.xlane.f32.xlu1 %v2879_v55 }
0x15a2   :  { %4282 = vmatpush3.bf16.msra.mxu0 %v4279_v37 }
0x15b2   :  { %4443 = vrot.lane.b32.xlu1 %v5061_v31, %s4584_s20 }
0x162a   :  { %v2878_v58 = vpop.xlane.xlu1 %2877 }
0x162b   :  { %4527 = vrcp.f32 %v2878_v58 }
0x162e   :  { %v2881_v57 = vpop.xlane.xlu1 %2880 }
0x162f   :  { %4529 = vrcp.f32 %v2881_v57 }
0x1632   :  { %v4444_v59 = vpop.permute.xlu1 %4443 }
0x1633   :  { %v4446_v61 = vunpack.i.h.bf16 %v4444_v59  ;;  %v4445_v49 = vunpack.i.l.bf16 %v4444_v59 }
0x1635   :  { %v4267_v62 = vpack.c.bf16 %v4446_v61, %v4445_v49  ;;  %v4528_v63 = vpop.eup %4527  ;;  %v3083_v49 = vrot.slane %v5042_v2, %v1507_v22  ;;  %v3422_v22 = vld [vmem:[%s5322_s4 + $0x388] sm:$0xff] }
0x1636   :  { %v2883_v31 = vmul.f32 %v4528_v63, %v4524_v50  ;;  %v4295_v50 = vpack.c.bf16 %v3418_v30, %v3417_v48 }
0x1637   :  { %4268 = vmatprep.subr.bf16.mxu1 %v4267_v62 }
0x1639   :  { %v4530_v6 = vpop.eup %4529 }
0x163a   :  { %v2885_v9 = vmul.f32 %v4530_v6, %v4526_v54  ;;  %v4299_v54 = vpack.c.bf16 %v3420_v53, %v3419_v52 }
0x1672   :  { %v3932_v0 = vpop.f32.mrb[26].mxu1 }
0x1673   :  { %v2677_v3 = vpop.f32.mrb[27].mxu1 }
0x1674   :  { %3935 = vmatprep.mubr.msk.f32.mxu1 %vm339_vm2, %v2677_v3 }
0x1675   :  { %3936 = vmatmul.mubr.msk.f32.vlgmr.msra.gmra.mrb[20].mxu1 %vm339_vm2, %v3932_v0  ;;  %v3089_v0 = vrot.slane %v5042_v2, %v1513_v23  ;;  %v3423_v23 = vld [vmem:[%s5322_s4 + $0x390] sm:$0xff] }
0x1676   :  { %4270 = vmatpush3.bf16.msra.mxu1 %v4267_v62  ;;  %3949 = vmatprep.mubr.msk.f32.mxu1 %vm427_vm4, %v2883_v31 }
0x1677   :  { %3952 = vmatprep.subr.mxu1 %v3404_v7 }
0x1679   :  { %3950 = vmatmul.mubr.msk.f32.vlgmr.msra.gmra.mrb[28].mxu1 %vm427_vm4, %v2885_v9 }
0x167a   :  { %3953 = vmatpush3.msra.mxu1 %v3404_v7 }
0x174c   :  { %v3951_v11 = vpop.f32.mrb[28].mxu1 }
0x174d   :  { %v2964_v13 = vpop.f32.mrb[29].mxu1 }
0x174e   :  { %3954 = vmatprep.mubr.msk.f32.mxu1 %vm339_vm2, %v2964_v13  ;;  %v3421_v13 = vld [vmem:[%s5322_s4 + $0x380] sm:$0xff] }
0x174f   :  { %3955 = vmatmul.mubr.msk.f32.vlgmr.msra.gmra.mrb[20].mxu1 %vm339_vm2, %v3951_v11  ;;  %v4303_v14 = vpack.c.bf16 %v3422_v22, %v3421_v13 }
0x1751   :  { %4304 = vmatprep.subr.bf16.mxu1 %v4303_v14 }
0x1752   :  { %4306 = vmatpush3.bf16.msra.mxu1 %v4303_v14 }
0x1822   :  { %v3956_v16 = vpop.f32.mrb[20].mxu1 }
0x1823   :  { %v5192_v10 = vadd.f32 %v3956_v16, %v1909_v15  ;;  %v3045_v32 = vpop.f32.mrb[21].mxu1  ;;  %v3424_v15 = vld [vmem:[%s5322_s4 + $0x398] sm:$0xff] }
0x1824   :  { %v5194_v40 = vadd.f32 %v3045_v32, %v1908_v17  ;;  %v4307_v16 = vpack.c.bf16 %v3424_v15, %v3423_v23  ;;  %v3425_v17 = vld [vmem:[%s5322_s4 + $0x3a0] sm:$0xff]  ;;  %v3426_v32 = vld [vmem:[%s5322_s4 + $0x3a8] sm:$0xff] }
0x1825   :  { %3058 = vadd.xlane.f32.xlu1 %v5192_v10  ;;  %v4311_v44 = vpack.c.bf16 %v3426_v32, %v3425_v17 }
0x1826   :  { %3056 = vadd.xlane.f32.xlu0 %v5194_v40  ;;  %4308 = vmatprep.subr.bf16.mxu1 %v4307_v16 }
0x1827   :  { %4310 = vmatpush3.bf16.msra.mxu1 %v4307_v16 }
0x1828   :  { %4312 = vmatprep.subr.bf16.mxu1 %v4311_v44 }
0x182b   :  { %4314 = vmatpush3.bf16.msra.mxu1 %v4311_v44 }
0x182c   :  { %4316 = vmatprep.subr.bf16.mxu1 %v4315_v8 }
0x182f   :  { %4318 = vmatpush3.bf16.msra.mxu1 %v4315_v8 }
0x18b2   :  { %v3059_v20 = vpop.xlane.xlu1 %3058 }
0x18b3   :  { %v3061_v21 = vmul.f32 0.03125, %v3059_v20  ;;  %v3057_v26 = vpop.xlane.xlu0 %3056  ;;  %v4319_v20 = vpack.c.bf16 %v3430_v19, %v3429_v1 }
0x18b4   :  { %v3060_v27 = vmul.f32 0.03125, %v3057_v26  ;;  %v3432_v26 = vld [vmem:[%s5322_s4 + $0x3d8] sm:$0xff] }
0x18b5   :  { %v3063_v28 = vsub.f32 %v5192_v10, %v3061_v21  ;;  %4320 = vmatprep.subr.bf16.mxu1 %v4319_v20  ;;  %v3431_v21 = vld [vmem:[%s5322_s4 + $0x3d0] sm:$0xff] }
0x18b6   :  { %v3062_v33 = vsub.f32 %v5194_v40, %v3060_v27  ;;  %4322 = vmatpush3.bf16.msra.mxu1 %v4319_v20  ;;  %v4323_v27 = vpack.c.bf16 %v3432_v26, %v3431_v21 }
0x18b7   :  { %v3065_v38 = vmul.f32 %v4670_v60, %v3063_v28  ;;  %v3433_v28 = vld [vmem:[%s5322_s4 + $0x3e0] sm:$0xff] }
0x18b8   :  { %v3064_v36 = vmul.f32 %v4670_v60, %v3062_v33  ;;  %v3412_v60 = vld [vmem:[%s5322_s4 + $0x338] sm:$0xff]  ;;  %4324 = vmatprep.subr.bf16.mxu1 %v4323_v27  ;;  %v3434_v33 = vld [vmem:[%s5322_s4 + $0x3e8] sm:$0xff] }
0x18b9   :  { %v3067_v25 = vmul.f32 %v3065_v38, %v3065_v38  ;;  %v4283_v41 = vpack.c.bf16 %v3412_v60, %v3411_v39 }
0x18ba   :  { %v3066_v24 = vmul.f32 %v3064_v36, %v3064_v36  ;;  %4326 = vmatpush3.bf16.msra.mxu1 %v4323_v27 }
0x18bb   :  { %4284 = vmatprep.subr.bf16.mxu0 %v4283_v41 }
0x18bc   :  { %3068 = vadd.xlane.f32.xlu0 %v3066_v24  ;;  %4286 = vmatpush3.bf16.msra.mxu0 %v4283_v41  ;;  %v3435_v24 = vld [vmem:[%s5322_s4 + $0x3f0] sm:$0xff] }
0x18bd   :  { %4288 = vmatprep.subr.bf16.mxu0 %v4287_v42 }
0x18c0   :  { %3070 = vadd.xlane.f32.xlu0 %v3067_v25  ;;  %4290 = vmatpush3.bf16.msra.mxu0 %v4287_v42 }
0x18c1   :  { %4292 = vmatprep.subr.bf16.mxu0 %v4291_v18 }
0x18c4   :  { %4294 = vmatpush3.bf16.msra.mxu0 %v4291_v18 }
0x18c5   :  { %4296 = vmatprep.subr.bf16.mxu0 %v4295_v50 }
0x18c8   :  { %4298 = vmatpush3.bf16.msra.mxu0 %v4295_v50 }
0x18c9   :  { %4300 = vmatprep.subr.bf16.mxu0 %v4299_v54 }
0x18cc   :  { %4302 = vmatpush3.bf16.msra.mxu0 %v4299_v54 }
0x1949   :  { %v3069_v55 = vpop.xlane.xlu0 %3068 }
0x194a   :  { %v3072_v56 = vmul.f32 0.03125, %v3069_v55 }
0x194c   :  { %v3074_v58 = vadd.f32 1e-06, %v3072_v56 }
0x194d   :  { %v3071_v57 = vpop.xlane.xlu0 %3070 }
0x194e   :  { %4531 = vrsqrt.f32 %v3074_v58  ;;  %v3073_v59 = vmul.f32 0.03125, %v3071_v57 }
0x1950   :  { %v3075_v61 = vadd.f32 1e-06, %v3073_v59 }
0x1952   :  { %4533 = vrsqrt.f32 %v3075_v61 }
0x1958   :  { %v4532_v62 = vpop.eup %4531 }
0x1959   :  { %v3078_v63 = vmul.f32 %v4532_v62, %v3064_v36  ;;  %v4327_v36 = vpack.c.bf16 %v3434_v33, %v3433_v28 }
0x195b   :  { %v3084_v3 = vmul.f32 %v3083_v49, %v3078_v63  ;;  %4328 = vmatprep.subr.bf16.mxu1 %v4327_v36 }
0x195c   :  { %v4534_v6 = vpop.eup %4533  ;;  %4330 = vmatpush3.bf16.msra.mxu1 %v4327_v36  ;;  %v3228_v36 = vrot.slane %v5042_v2, %v1652_v12 }
0x195d   :  { %v3090_v31 = vadd.f32 %v3089_v0, %v3084_v3  ;;  %v3079_v7 = vmul.f32 %v4534_v6, %v3065_v38  ;;  %v3436_v38 = vld [vmem:[%s5322_s4 + $0x3f8] sm:$0xff] }
0x195e   :  { %v4331_v25 = vpack.c.bf16 %v3436_v38, %v3435_v24 }
0x195f   :  { %3989 = vmatprep.mubr.f32.mxu0 %v3090_v31  ;;  %v3085_v9 = vmul.f32 %v3083_v49, %v3079_v7 }
0x1960   :  { %4332 = vmatprep.subr.bf16.mxu1 %v4331_v25 }
0x1961   :  { %v3091_v11 = vadd.f32 %v3089_v0, %v3085_v9  ;;  %4334 = vmatpush3.bf16.msra.mxu1 %v4331_v25 }
0x1963   :  { %3990 = vmatmul.mubr.f32.vlgmr.msra.gmra.mrb[18].mxu0 %v3091_v11 }
0x1a36   :  { %v3991_v5 = vpop.f32.mrb[18].mxu0 }
0x1a37   :  { %v3168_v37 = vadd.f32 %v3991_v5, %v3095_v34  ;;  %v3162_v39 = vpop.f32.mrb[19].mxu0 }
0x1a38   :  { %v3163_v60 = vadd.f32 %v3162_v39, %v3095_v34 }
0x1a39   :  { %v3172_v41 = vand.u32 2147483647, %v3168_v37  ;;  %vm3214_vm7 = vcmp.lt.f32.partialorder %v3168_v37, 0.0  ;;  %v3220_v27 = vmul.f32 0.5, %v3168_v37 }
0x1a3a   :  { %v3171_v47 = vand.u32 2147483647, %v3163_v60  ;;  %vm3213_vm8 = vcmp.lt.f32.partialorder %v3163_v60, 0.0  ;;  %v3219_v21 = vmul.f32 0.5, %v3163_v60 }
0x1a3b   :  { %v3174_v43 = vmul.f32 0.70710677, %v3172_v41 }
0x1a3c   :  { %v3173_v42 = vmul.f32 0.70710677, %v3171_v47 }
0x1a3d   :  { %v3176_v45 = vmul.f32 0.3275911, %v3174_v43  ;;  %v3202_v30 = vmul.f32 %v3174_v43, %v3174_v43 }
0x1a3e   :  { %v3175_v46 = vmul.f32 0.3275911, %v3173_v42  ;;  %v3201_v50 = vmul.f32 %v3173_v42, %v3173_v42 }
0x1a3f   :  { %v3178_v18 = vadd.f32 1.0, %v3176_v45  ;;  %v3204_v53 = vsub.f32 0.0, %v3202_v30 }
0x1a40   :  { %v3177_v48 = vadd.f32 1.0, %v3175_v46  ;;  %v3203_v55 = vsub.f32 0.0, %v3201_v50 }
0x1a41   :  { %4535 = vrcp.f32 %v3178_v18  ;;  %v3207_v57 = vmul.f32 1.442695, %v3204_v53 }
0x1a42   :  { %4537 = vrcp.f32 %v3177_v48  ;;  %v3205_v49 = vmul.f32 1.442695, %v3203_v55 }
0x1a43   :  { %4539 = vpow2.f32 %v3207_v57 }
0x1a44   :  { %4541 = vpow2.f32 %v3205_v49 }
0x1a4b   :  { %v4536_v52 = vpop.eup %4535 }
0x1a4c   :  { %v4538_v54 = vpop.eup %4537  ;;  %v3184_v4 = vmul.f32 1.0614054, %v4536_v52 }
0x1a4d   :  { %v3183_v56 = vmul.f32 1.0614054, %v4538_v54  ;;  %v4540_v23 = vpop.eup %4539 }
0x1a4e   :  { %v3186_v58 = vadd.f32 -1.4531521, %v3184_v4  ;;  %v4542_v16 = vpop.eup %4541 }
0x1a4f   :  { %v3185_v59 = vadd.f32 -1.4531521, %v3183_v56 }
0x1a50   :  { %v3188_v61 = vmul.f32 %v4536_v52, %v3186_v58 }
0x1a51   :  { %v3187_v62 = vmul.f32 %v4538_v54, %v3185_v59 }
0x1a52   :  { %v3190_v63 = vadd.f32 1.4214138, %v3188_v61 }
0x1a53   :  { %v3189_v0 = vadd.f32 1.4214138, %v3187_v62 }
0x1a54   :  { %v3192_v3 = vmul.f32 %v4536_v52, %v3190_v63 }
0x1a55   :  { %v3191_v6 = vmul.f32 %v4538_v54, %v3189_v0 }
0x1a56   :  { %v3194_v31 = vadd.f32 -0.28449672, %v3192_v3 }
0x1a57   :  { %v3193_v7 = vadd.f32 -0.28449672, %v3191_v6 }
0x1a58   :  { %v3196_v9 = vmul.f32 %v4536_v52, %v3194_v31 }
0x1a59   :  { %v3195_v11 = vmul.f32 %v4538_v54, %v3193_v7 }
0x1a5a   :  { %v3198_v13 = vadd.f32 0.2548296, %v3196_v9 }
0x1a5b   :  { %v3197_v22 = vadd.f32 0.2548296, %v3195_v11 }
0x1a5c   :  { %v3200_v14 = vmul.f32 %v4536_v52, %v3198_v13 }
0x1a5d   :  { %v3199_v15 = vmul.f32 %v4538_v54, %v3197_v22 }
0x1a5e   :  { %v3210_v17 = vmul.f32 %v4540_v23, %v3200_v14 }
0x1a5f   :  { %v3209_v32 = vmul.f32 %v4542_v16, %v3199_v15 }
0x1a60   :  { %v3212_v44 = vsub.f32 1.0, %v3210_v17 }
0x1a61   :  { %v3211_v35 = vsub.f32 1.0, %v3209_v32 }
0x1a62   :  { %v3216_v51 = vsub.f32 0.0, %v3212_v44 }
0x1a63   :  { %v3215_v8 = vsub.f32 0.0, %v3211_v35 }
0x1a64   :  { %v3218_v1 = vsel %vm3214_vm7, %v3216_v51, %v3212_v44 }
0x1a65   :  { %v3222_v19 = vadd.f32 1.0, %v3218_v1  ;;  %v3217_v20 = vsel %vm3213_vm8, %v3215_v8, %v3211_v35 }
0x1a66   :  { %v3221_v26 = vadd.f32 1.0, %v3217_v20 }
0x1a67   :  { %v3224_v33 = vmul.f32 %v3222_v19, %v3220_v27 }
0x1a68   :  { %v3223_v28 = vmul.f32 %v3221_v26, %v3219_v21 }
0x1a6a   :  { %4024 = vmatprep.mubr.f32.mxu1 %v3223_v28 }
0x1a6b   :  { %4025 = vmatmul.mubr.f32.vlgmr.msra.gmra.mrb[30].mxu1 %v3224_v33 }
0x1b3e   :  { %v4026_v24 = vpop.f32.mrb[30].mxu1 }
0x1b3f   :  { %v3301_v38 = vadd.f32 %v4026_v24, %v3228_v36  ;;  %v3295_v25 = vpop.f32.mrb[31].mxu1 }
0x1b40   :  { %v3296_v34 = vadd.f32 %v3295_v25, %v3228_v36 }
0x1b41   :  { %v3305_v5 = vadd.f32 %v5192_v10, %v3301_v38 }
0x1b42   :  { %v3304_v39 = vadd.f32 %v5194_v40, %v3296_v34 }
0x1b43   :  { %3307 = vst [vmem:[%s5324_s6 + $0x8] sm:$0xff] %v3305_v5 }
0x1b44   :  { %3306 = vst [vmem:[%s5324_s6] sm:$0xff] %v3304_v39 }
0x1b45   :  { %3312 = vsyncpa [#allocation3], 1 }

</bundles_post_ra>
